<compile_context>
chip_gen: v7x
topology: tpu7x:2x2x1
jax: 0.10.0
libtpu: 0.0.40
codegen_flags: <defaults>
</compile_context>

<pallas_src>
import jax
import jax.numpy as jnp
import numpy as np
from jax.experimental import pallas as pl
from jax.experimental.pallas import tpu as pltpu

BATCH_PAD = 8   # pad batch to the 8-sublane granularity
TK = 512        # K-chunk of the hoisted input projection (pipelined over grid)


# ----------------------------- Pallas kernel ------------------------------ #
def lstm_kernel(x_ref, wih_ref, whh_ref, b_ref, wfc_ref, bfc_ref,
                out_ref, gx_sc):
    """grid=(I//TK,): pipelined input projection, then recurrence on last step.

    x_ref   : (T*Bp, TK)   bf16, time-major rows (row = t*Bp + b), K-chunk k
    wih_ref : (TK, 4*Hp)   bf16, K-chunk k of W_ih^T
    whh_ref : (Hp, 4*Hp)   bf16
    b_ref   : (1, 4*Hp)    f32   (b_ih + b_hh, padded cols zero)
    wfc_ref : (Hp, C)      f32
    bfc_ref : (1, C)       f32
    out_ref : (Bp, C)      f32
    gx_sc   : (T*Bp, 4*Hp) f32 VMEM scratch accumulating the input projection
    """
    k = pl.program_id(0)
    nk = pl.num_programs(0)
    bp = out_ref.shape[0]
    hp = whh_ref.shape[0]
    t_steps = gx_sc.shape[0] // bp

    # ---- Phase 1 (pipelined over the K grid axis): partial input projection.
    # bf16 x chunk times bf16 W_ih chunk on the MXU, f32 accumulation.
    gx_part = jnp.dot(x_ref[...], wih_ref[...],
                      preferred_element_type=jnp.float32)

    @pl.when(k == 0)
    def _():
        gx_sc[...] = gx_part + b_ref[...]   # fold the (b_ih + b_hh) bias once

    @pl.when(k != 0)
    def _():
        gx_sc[...] += gx_part

    # ---- Phase 2 + 3: serial recurrence and FC head, only on the last K step.
    @pl.when(k == nk - 1)
    def _():
        whh = whh_ref[...]                      # bf16, 32 vregs (vs 64 in f32)
        h = jnp.zeros((bp, hp), jnp.float32)
        c = jnp.zeros((bp, hp), jnp.float32)
        # T is small & static -> fully unrolled; only the tiny (Bp,Hp)x(Hp,4Hp)
        # recurrent matmul sits inside the serial chain.
        for t in range(t_steps):
            gates = gx_sc[pl.ds(t * bp, bp), :] + jnp.dot(
                h.astype(jnp.bfloat16), whh,
                preferred_element_type=jnp.float32)
            i_g = jax.nn.sigmoid(gates[:, 0 * hp:1 * hp])
            f_g = jax.nn.sigmoid(gates[:, 1 * hp:2 * hp])
            g_g = jnp.tanh(gates[:, 2 * hp:3 * hp])
            o_g = jax.nn.sigmoid(gates[:, 3 * hp:4 * hp])
            c = f_g * c + i_g * g_g
            h = o_g * jnp.tanh(c)

        # Final linear head on the last hidden state (tiny; keep f32).
        out_ref[...] = (jnp.dot(h, wfc_ref[...],
                                preferred_element_type=jnp.float32)
                        + bfc_ref[...]).astype(out_ref.dtype)


# ------------------------------- Wrapper ----------------------------------- #
def lstm_model_forward(x, padded_params):
    """x: (B, T, I) float32 (batch_first, like PyTorch). Returns (B, C)."""
    wih_t, whh_t, b, wfc_t, bfc = padded_params
    B, T, I = x.shape
    Hp = whh_t.shape[0]
    C = wfc_t.shape[1]
    Bp = BATCH_PAD
    assert I % TK == 0
    nk = I // TK

    # Pad batch to sublane granularity, go time-major, flatten to (T*Bp, I).
    # Padded batch rows evolve independently and are sliced off at the end.
    x_bf = jnp.zeros((Bp, T, I), jnp.bfloat16).at[:B].set(x.astype(jnp.bfloat16))
    x_tm = jnp.transpose(x_bf, (1, 0, 2)).reshape(T * Bp, I)

    out_padded = pl.pallas_call(
        lstm_kernel,
        out_shape=jax.ShapeDtypeStruct((Bp, C), jnp.float32),
        grid_spec=pltpu.PrefetchScalarGridSpec(
            num_scalar_prefetch=0,
            grid=(nk,),                                        # K-split Phase 1
            in_specs=[
                pl.BlockSpec((T * Bp, TK), lambda k: (0, k)),   # x chunk (bf16)
                pl.BlockSpec((TK, 4 * Hp), lambda k: (k, 0)),   # W_ih^T chunk (bf16)
                pl.BlockSpec((Hp, 4 * Hp), lambda k: (0, 0)),   # W_hh^T (bf16)
                pl.BlockSpec((1, 4 * Hp), lambda k: (0, 0)),    # b_ih + b_hh
                pl.BlockSpec((Hp, C), lambda k: (0, 0)),        # W_fc^T
                pl.BlockSpec((1, C), lambda k: (0, 0)),         # b_fc
            ],
            out_specs=pl.BlockSpec((Bp, C), lambda k: (0, 0)),
            scratch_shapes=[
                pltpu.VMEM((T * Bp, 4 * Hp), jnp.float32),      # input-proj accum
            ],
        ),
        # The K axis is a reduction into gx_sc (and the output is written only
        # on the last step) -> "arbitrary".  A leading 'parallel' batch axis
        # would only pay off on v7x if the batch grew well beyond 8.
        compiler_params=pltpu.CompilerParams(
            dimension_semantics=("arbitrary",)),
    )(x_tm,
      wih_t.astype(jnp.bfloat16),
      whh_t.astype(jnp.bfloat16),
      b, wfc_t, bfc)

    return out_padded[:B]


# --------------------------- Parameter helpers ----------------------------- #
def init_raw_params(key, input_size, hidden_size, num_classes):
    """Deterministic init matching PyTorch's U(-1/sqrt(H), 1/sqrt(H))."""
    k = 1.0 / np.sqrt(hidden_size)
    ks = jax.random.split(key, 6)
    w_ih = jax.random.uniform(ks[0], (4 * hidden_size, input_size), jnp.float32, -k, k)
    w_hh = jax.random.uniform(ks[1], (4 * hidden_size, hidden_size), jnp.float32, -k, k)
    b_ih = jax.random.uniform(ks[2], (4 * hidden_size,), jnp.float32, -k, k)
    b_hh = jax.random.uniform(ks[3], (4 * hidden_size,), jnp.float32, -k, k)
    w_fc = jax.random.uniform(ks[4], (num_classes, hidden_size), jnp.float32, -k, k)
    b_fc = jax.random.uniform(ks[5], (num_classes,), jnp.float32, -k, k)
    return w_ih, w_hh, b_ih, b_hh, w_fc, b_fc


def pad_params(raw, hidden_size, hp):
    """Transpose weights for right-mult and zero-pad hidden dim H -> Hp."""
    w_ih, w_hh, b_ih, b_hh, w_fc, b_fc = raw
    I = w_ih.shape[1]
    C = w_fc.shape[0]
    wih_t = jnp.zeros((I, 4 * hp), jnp.float32)
    whh_t = jnp.zeros((hp, 4 * hp), jnp.float32)
    b = jnp.zeros((1, 4 * hp), jnp.float32)
    for g in range(4):  # gate order i, f, g, o
        rows = slice(g * hidden_size, (g + 1) * hidden_size)
        cols = slice(g * hp, g * hp + hidden_size)
        wih_t = wih_t.at[:, cols].set(w_ih[rows, :].T)
        whh_t = whh_t.at[:hidden_size, cols].set(w_hh[rows, :].T)
        b = b.at[0, cols].set(b_ih[rows] + b_hh[rows])
    wfc_t = jnp.zeros((hp, C), jnp.float32).at[:hidden_size, :].set(w_fc.T)
    bfc = b_fc.reshape(1, C)
    return wih_t, whh_t, b, wfc_t, bfc


# --------------------------- Pure-JAX reference ----------------------------- #
def reference_forward(x, raw, hidden_size):
    w_ih, w_hh, b_ih, b_hh, w_fc, b_fc = raw
    B = x.shape[0]
    hi = jax.lax.Precision.HIGHEST
    h = jnp.zeros((B, hidden_size), jnp.float32)
    c = jnp.zeros((B, hidden_size), jnp.float32)

    def step(carry, x_t):
        h, c = carry
        gates = (jnp.dot(x_t, w_ih.T, precision=hi) + b_ih
                 + jnp.dot(h, w_hh.T, precision=hi) + b_hh)
        i, f, g, o = jnp.split(gates, 4, axis=-1)
        c = jax.nn.sigmoid(f) * c + jax.nn.sigmoid(i) * jnp.tanh(g)
        h = jax.nn.sigmoid(o) * jnp.tanh(c)
        return (h, c), None

    (h, c), _ = jax.lax.scan(step, (h, c), jnp.transpose(x, (1, 0, 2)))
    return jnp.dot(h, w_fc.T, precision=hi) + b_fc


# --------------------------------- Main ------------------------------------ #
if __name__ == "__main__":
    # Module constants: input_size=2048, hidden_size=126, num_classes=8.
    INPUT_SIZE = 2048
    HIDDEN = 126
    HIDDEN_PADDED = 128
    NUM_CLASSES = 8
    B, T = 2, 8   # small batch / sequence length

    key = jax.random.PRNGKey(0)
    kx, kp = jax.random.split(key)
    x = jax.random.normal(kx, (B, T, INPUT_SIZE), jnp.float32)

    raw = init_raw_params(kp, INPUT_SIZE, HIDDEN, NUM_CLASSES)
    padded = pad_params(raw, HIDDEN, HIDDEN_PADDED)

    out = lstm_model_forward(x, padded)
    out = jax.block_until_ready(out)

    ref = jax.block_until_ready(reference_forward(x, raw, HIDDEN))
    assert out.shape == (B, NUM_CLASSES)
    assert np.allclose(np.asarray(out), np.asarray(ref), atol=5e-2, rtol=5e-2), (
        "Pallas LSTM output mismatch vs. reference")

    print("KERNEL_OK")
</pallas_src>

<mosaic_0001>
module attributes {stable_mosaic.version = 11 : i64} {
  func.func @lstm_kernel(%arg0: i32, %arg1: memref<64x512xbf16, #tpu.memory_space<vmem>>, %arg2: memref<512x512xbf16, #tpu.memory_space<vmem>>, %arg3: memref<128x512xbf16, #tpu.memory_space<vmem>>, %arg4: memref<1x512xf32, #tpu.memory_space<vmem>>, %arg5: memref<128x8xf32, #tpu.memory_space<vmem>>, %arg6: memref<1x8xf32, #tpu.memory_space<vmem>>, %arg7: memref<8x8xf32, #tpu.memory_space<vmem>>, %arg8: memref<64x512xf32, #tpu.memory_space<vmem>>) attributes {dimension_semantics = [#tpu.dimension_semantics<arbitrary>], iteration_bounds = array<i64: 4>, scalar_prefetch = 0 : i64, scratch_operands = 1 : i64, tpu.core_type = #tpu.core_type<tc>, window_params = [{transform_indices = @transform_0, window_bounds = array<i64: 64, 512>}, {transform_indices = @transform_1, window_bounds = array<i64: 512, 512>}, {pipeline_mode = #tpu.pipeline_mode<synchronous>, transform_indices = @transform_2, window_bounds = array<i64: 128, 512>}, {pipeline_mode = #tpu.pipeline_mode<synchronous>, transform_indices = @transform_3, window_bounds = array<i64: 1, 512>}, {pipeline_mode = #tpu.pipeline_mode<synchronous>, transform_indices = @transform_4, window_bounds = array<i64: 128, 8>}, {pipeline_mode = #tpu.pipeline_mode<synchronous>, transform_indices = @transform_5, window_bounds = array<i64: 1, 8>}, {pipeline_mode = #tpu.pipeline_mode<synchronous>, transform_indices = @transform_6, window_bounds = array<i64: 8, 8>}]} {
    %c0 = arith.constant 0 : index
    %c0_0 = arith.constant 0 : index
    %0 = vector.load %arg1[%c0, %c0_0] : memref<64x512xbf16, #tpu.memory_space<vmem>>, vector<64x512xbf16>
    %c0_1 = arith.constant 0 : index
    %c0_2 = arith.constant 0 : index
    %1 = vector.load %arg2[%c0_1, %c0_2] : memref<512x512xbf16, #tpu.memory_space<vmem>>, vector<512x512xbf16>
    %cst = arith.constant dense<0.000000e+00> : vector<64x512xf32>
    %2 = tpu.matmul %0, %1, %cst {dimension_numbers = #tpu.dot_dimension_numbers<[1], [0], [0], [1], [0, 0, 1, 1], [], []>} : vector<64x512xbf16>, vector<512x512xbf16>, vector<64x512xf32> -> vector<64x512xf32>
    %c0_i32 = arith.constant 0 : i32
    %3 = arith.cmpi eq, %arg0, %c0_i32 : i32
    %4 = arith.extui %3 : i1 to i32
    %c0_i32_3 = arith.constant 0 : i32
    %5 = arith.cmpi ne, %4, %c0_i32_3 : i32
    scf.if %5 {
      %c0_7 = arith.constant 0 : index
      %c0_8 = arith.constant 0 : index
      %12 = vector.load %arg4[%c0_7, %c0_8] : memref<1x512xf32, #tpu.memory_space<vmem>>, vector<1x512xf32>
      %13 = vector.broadcast %12 : vector<1x512xf32> to vector<64x512xf32>
      %14 = arith.addf %2, %13 : vector<64x512xf32>
      %c0_9 = arith.constant 0 : index
      %c0_10 = arith.constant 0 : index
      %15 = vector.load %arg8[%c0_9, %c0_10] : memref<64x512xf32, #tpu.memory_space<vmem>>, vector<64x512xf32>
      tpu.vector_store %arg8[%c0_9, %c0_10], %14 {strides = array<i32>} : memref<64x512xf32, #tpu.memory_space<vmem>>, vector<64x512xf32>,
    } else {
    }
    %c0_i32_4 = arith.constant 0 : i32
    %6 = arith.cmpi ne, %arg0, %c0_i32_4 : i32
    %7 = arith.extui %6 : i1 to i32
    %c0_i32_5 = arith.constant 0 : i32
    %8 = arith.cmpi ne, %7, %c0_i32_5 : i32
    scf.if %8 {
      %c0_7 = arith.constant 0 : index
      %c0_8 = arith.constant 0 : index
      %12 = vector.load %arg8[%c0_7, %c0_8] : memref<64x512xf32, #tpu.memory_space<vmem>>, vector<64x512xf32>
      %13 = arith.addf %12, %2 : vector<64x512xf32>
      %c0_9 = arith.constant 0 : index
      %c0_10 = arith.constant 0 : index
      %14 = vector.load %arg8[%c0_9, %c0_10] : memref<64x512xf32, #tpu.memory_space<vmem>>, vector<64x512xf32>
      tpu.vector_store %arg8[%c0_9, %c0_10], %13 {strides = array<i32>} : memref<64x512xf32, #tpu.memory_space<vmem>>, vector<64x512xf32>,
    } else {
    }
    %c3_i32 = arith.constant 3 : i32
    %9 = arith.cmpi eq, %arg0, %c3_i32 : i32
    %10 = arith.extui %9 : i1 to i32
    %c0_i32_6 = arith.constant 0 : i32
    %11 = arith.cmpi ne, %10, %c0_i32_6 : i32
    scf.if %11 {
      %c0_7 = arith.constant 0 : index
      %c0_8 = arith.constant 0 : index
      %12 = vector.load %arg3[%c0_7, %c0_8] : memref<128x512xbf16, #tpu.memory_space<vmem>>, vector<128x512xbf16>
      %cst_9 = arith.constant 0.000000e+00 : f32
      %13 = vector.broadcast %cst_9 : f32 to vector<8x128xf32>
      %cst_10 = arith.constant 0.000000e+00 : f32
      %14 = vector.broadcast %cst_10 : f32 to vector<8x128xf32>
      %c0_11 = arith.constant 0 : index
      %c0_12 = arith.constant 0 : index
      %15 = vector.load %arg8[%c0_11, %c0_12] : memref<64x512xf32, #tpu.memory_space<vmem>>, vector<8x512xf32>
      %16 = arith.truncf %13 : vector<8x128xf32> to vector<8x128xbf16>
      %cst_13 = arith.constant dense<0.000000e+00> : vector<8x512xf32>
      %17 = tpu.matmul %16, %12, %cst_13 {dimension_numbers = #tpu.dot_dimension_numbers<[1], [0], [0], [1], [0, 0, 1, 1], [], []>} : vector<8x128xbf16>, vector<128x512xbf16>, vector<8x512xf32> -> vector<8x512xf32>
      %18 = arith.addf %15, %17 : vector<8x512xf32>
      %19 = vector.extract_strided_slice %18 {offsets = [0, 0], sizes = [8, 128], strides = [1, 1]} : vector<8x512xf32> to vector<8x128xf32>
      %20 = arith.negf %19 : vector<8x128xf32>
      %21 = math.exp %20 : vector<8x128xf32>
      %cst_14 = arith.constant 1.000000e+00 : f32
      %22 = vector.broadcast %cst_14 : f32 to vector<8x128xf32>
      %23 = arith.addf %22, %21 : vector<8x128xf32>
      %24 = arith.divf %22, %23 : vector<8x128xf32>
      %25 = vector.extract_strided_slice %18 {offsets = [0, 128], sizes = [8, 128], strides = [1, 1]} : vector<8x512xf32> to vector<8x128xf32>
      %26 = arith.negf %25 : vector<8x128xf32>
      %27 = math.exp %26 : vector<8x128xf32>
      %cst_15 = arith.constant 1.000000e+00 : f32
      %28 = vector.broadcast %cst_15 : f32 to vector<8x128xf32>
      %29 = arith.addf %28, %27 : vector<8x128xf32>
      %30 = arith.divf %28, %29 : vector<8x128xf32>
      %31 = vector.extract_strided_slice %18 {offsets = [0, 256], sizes = [8, 128], strides = [1, 1]} : vector<8x512xf32> to vector<8x128xf32>
      %32 = math.tanh %31 : vector<8x128xf32>
      %33 = vector.extract_strided_slice %18 {offsets = [0, 384], sizes = [8, 128], strides = [1, 1]} : vector<8x512xf32> to vector<8x128xf32>
      %34 = arith.negf %33 : vector<8x128xf32>
      %35 = math.exp %34 : vector<8x128xf32>
      %cst_16 = arith.constant 1.000000e+00 : f32
      %36 = vector.broadcast %cst_16 : f32 to vector<8x128xf32>
      %37 = arith.addf %36, %35 : vector<8x128xf32>
      %38 = arith.divf %36, %37 : vector<8x128xf32>
      %39 = arith.mulf %30, %14 : vector<8x128xf32>
      %40 = arith.mulf %24, %32 : vector<8x128xf32>
      %41 = arith.addf %39, %40 : vector<8x128xf32>
      %42 = math.tanh %41 : vector<8x128xf32>
      %43 = arith.mulf %38, %42 : vector<8x128xf32>
      %c8 = arith.constant 8 : index
      %c0_17 = arith.constant 0 : index
      %44 = vector.load %arg8[%c8, %c0_17] : memref<64x512xf32, #tpu.memory_space<vmem>>, vector<8x512xf32>
      %45 = arith.truncf %43 : vector<8x128xf32> to vector<8x128xbf16>
      %cst_18 = arith.constant dense<0.000000e+00> : vector<8x512xf32>
      %46 = tpu.matmul %45, %12, %cst_18 {dimension_numbers = #tpu.dot_dimension_numbers<[1], [0], [0], [1], [0, 0, 1, 1], [], []>} : vector<8x128xbf16>, vector<128x512xbf16>, vector<8x512xf32> -> vector<8x512xf32>
      %47 = arith.addf %44, %46 : vector<8x512xf32>
      %48 = vector.extract_strided_slice %47 {offsets = [0, 0], sizes = [8, 128], strides = [1, 1]} : vector<8x512xf32> to vector<8x128xf32>
      %49 = arith.negf %48 : vector<8x128xf32>
      %50 = math.exp %49 : vector<8x128xf32>
      %cst_19 = arith.constant 1.000000e+00 : f32
      %51 = vector.broadcast %cst_19 : f32 to vector<8x128xf32>
      %52 = arith.addf %51, %50 : vector<8x128xf32>
      %53 = arith.divf %51, %52 : vector<8x128xf32>
      %54 = vector.extract_strided_slice %47 {offsets = [0, 128], sizes = [8, 128], strides = [1, 1]} : vector<8x512xf32> to vector<8x128xf32>
      %55 = arith.negf %54 : vector<8x128xf32>
      %56 = math.exp %55 : vector<8x128xf32>
      %cst_20 = arith.constant 1.000000e+00 : f32
      %57 = vector.broadcast %cst_20 : f32 to vector<8x128xf32>
      %58 = arith.addf %57, %56 : vector<8x128xf32>
      %59 = arith.divf %57, %58 : vector<8x128xf32>
      %60 = vector.extract_strided_slice %47 {offsets = [0, 256], sizes = [8, 128], strides = [1, 1]} : vector<8x512xf32> to vector<8x128xf32>
      %61 = math.tanh %60 : vector<8x128xf32>
      %62 = vector.extract_strided_slice %47 {offsets = [0, 384], sizes = [8, 128], strides = [1, 1]} : vector<8x512xf32> to vector<8x128xf32>
      %63 = arith.negf %62 : vector<8x128xf32>
      %64 = math.exp %63 : vector<8x128xf32>
      %cst_21 = arith.constant 1.000000e+00 : f32
      %65 = vector.broadcast %cst_21 : f32 to vector<8x128xf32>
      %66 = arith.addf %65, %64 : vector<8x128xf32>
      %67 = arith.divf %65, %66 : vector<8x128xf32>
      %68 = arith.mulf %59, %41 : vector<8x128xf32>
      %69 = arith.mulf %53, %61 : vector<8x128xf32>
      %70 = arith.addf %68, %69 : vector<8x128xf32>
      %71 = math.tanh %70 : vector<8x128xf32>
      %72 = arith.mulf %67, %71 : vector<8x128xf32>
      %c16 = arith.constant 16 : index
      %c0_22 = arith.constant 0 : index
      %73 = vector.load %arg8[%c16, %c0_22] : memref<64x512xf32, #tpu.memory_space<vmem>>, vector<8x512xf32>
      %74 = arith.truncf %72 : vector<8x128xf32> to vector<8x128xbf16>
      %cst_23 = arith.constant dense<0.000000e+00> : vector<8x512xf32>
      %75 = tpu.matmul %74, %12, %cst_23 {dimension_numbers = #tpu.dot_dimension_numbers<[1], [0], [0], [1], [0, 0, 1, 1], [], []>} : vector<8x128xbf16>, vector<128x512xbf16>, vector<8x512xf32> -> vector<8x512xf32>
      %76 = arith.addf %73, %75 : vector<8x512xf32>
      %77 = vector.extract_strided_slice %76 {offsets = [0, 0], sizes = [8, 128], strides = [1, 1]} : vector<8x512xf32> to vector<8x128xf32>
      %78 = arith.negf %77 : vector<8x128xf32>
      %79 = math.exp %78 : vector<8x128xf32>
      %cst_24 = arith.constant 1.000000e+00 : f32
      %80 = vector.broadcast %cst_24 : f32 to vector<8x128xf32>
      %81 = arith.addf %80, %79 : vector<8x128xf32>
      %82 = arith.divf %80, %81 : vector<8x128xf32>
      %83 = vector.extract_strided_slice %76 {offsets = [0, 128], sizes = [8, 128], strides = [1, 1]} : vector<8x512xf32> to vector<8x128xf32>
      %84 = arith.negf %83 : vector<8x128xf32>
      %85 = math.exp %84 : vector<8x128xf32>
      %cst_25 = arith.constant 1.000000e+00 : f32
      %86 = vector.broadcast %cst_25 : f32 to vector<8x128xf32>
      %87 = arith.addf %86, %85 : vector<8x128xf32>
      %88 = arith.divf %86, %87 : vector<8x128xf32>
      %89 = vector.extract_strided_slice %76 {offsets = [0, 256], sizes = [8, 128], strides = [1, 1]} : vector<8x512xf32> to vector<8x128xf32>
      %90 = math.tanh %89 : vector<8x128xf32>
      %91 = vector.extract_strided_slice %76 {offsets = [0, 384], sizes = [8, 128], strides = [1, 1]} : vector<8x512xf32> to vector<8x128xf32>
      %92 = arith.negf %91 : vector<8x128xf32>
      %93 = math.exp %92 : vector<8x128xf32>
      %cst_26 = arith.constant 1.000000e+00 : f32
      %94 = vector.broadcast %cst_26 : f32 to vector<8x128xf32>
      %95 = arith.addf %94, %93 : vector<8x128xf32>
      %96 = arith.divf %94, %95 : vector<8x128xf32>
      %97 = arith.mulf %88, %70 : vector<8x128xf32>
      %98 = arith.mulf %82, %90 : vector<8x128xf32>
      %99 = arith.addf %97, %98 : vector<8x128xf32>
      %100 = math.tanh %99 : vector<8x128xf32>
      %101 = arith.mulf %96, %100 : vector<8x128xf32>
      %c24 = arith.constant 24 : index
      %c0_27 = arith.constant 0 : index
      %102 = vector.load %arg8[%c24, %c0_27] : memref<64x512xf32, #tpu.memory_space<vmem>>, vector<8x512xf32>
      %103 = arith.truncf %101 : vector<8x128xf32> to vector<8x128xbf16>
      %cst_28 = arith.constant dense<0.000000e+00> : vector<8x512xf32>
      %104 = tpu.matmul %103, %12, %cst_28 {dimension_numbers = #tpu.dot_dimension_numbers<[1], [0], [0], [1], [0, 0, 1, 1], [], []>} : vector<8x128xbf16>, vector<128x512xbf16>, vector<8x512xf32> -> vector<8x512xf32>
      %105 = arith.addf %102, %104 : vector<8x512xf32>
      %106 = vector.extract_strided_slice %105 {offsets = [0, 0], sizes = [8, 128], strides = [1, 1]} : vector<8x512xf32> to vector<8x128xf32>
      %107 = arith.negf %106 : vector<8x128xf32>
      %108 = math.exp %107 : vector<8x128xf32>
      %cst_29 = arith.constant 1.000000e+00 : f32
      %109 = vector.broadcast %cst_29 : f32 to vector<8x128xf32>
      %110 = arith.addf %109, %108 : vector<8x128xf32>
      %111 = arith.divf %109, %110 : vector<8x128xf32>
      %112 = vector.extract_strided_slice %105 {offsets = [0, 128], sizes = [8, 128], strides = [1, 1]} : vector<8x512xf32> to vector<8x128xf32>
      %113 = arith.negf %112 : vector<8x128xf32>
      %114 = math.exp %113 : vector<8x128xf32>
      %cst_30 = arith.constant 1.000000e+00 : f32
      %115 = vector.broadcast %cst_30 : f32 to vector<8x128xf32>
      %116 = arith.addf %115, %114 : vector<8x128xf32>
      %117 = arith.divf %115, %116 : vector<8x128xf32>
      %118 = vector.extract_strided_slice %105 {offsets = [0, 256], sizes = [8, 128], strides = [1, 1]} : vector<8x512xf32> to vector<8x128xf32>
      %119 = math.tanh %118 : vector<8x128xf32>
      %120 = vector.extract_strided_slice %105 {offsets = [0, 384], sizes = [8, 128], strides = [1, 1]} : vector<8x512xf32> to vector<8x128xf32>
      %121 = arith.negf %120 : vector<8x128xf32>
      %122 = math.exp %121 : vector<8x128xf32>
      %cst_31 = arith.constant 1.000000e+00 : f32
      %123 = vector.broadcast %cst_31 : f32 to vector<8x128xf32>
      %124 = arith.addf %123, %122 : vector<8x128xf32>
      %125 = arith.divf %123, %124 : vector<8x128xf32>
      %126 = arith.mulf %117, %99 : vector<8x128xf32>
      %127 = arith.mulf %111, %119 : vector<8x128xf32>
      %128 = arith.addf %126, %127 : vector<8x128xf32>
      %129 = math.tanh %128 : vector<8x128xf32>
      %130 = arith.mulf %125, %129 : vector<8x128xf32>
      %c32 = arith.constant 32 : index
      %c0_32 = arith.constant 0 : index
      %131 = vector.load %arg8[%c32, %c0_32] : memref<64x512xf32, #tpu.memory_space<vmem>>, vector<8x512xf32>
      %132 = arith.truncf %130 : vector<8x128xf32> to vector<8x128xbf16>
      %cst_33 = arith.constant dense<0.000000e+00> : vector<8x512xf32>
      %133 = tpu.matmul %132, %12, %cst_33 {dimension_numbers = #tpu.dot_dimension_numbers<[1], [0], [0], [1], [0, 0, 1, 1], [], []>} : vector<8x128xbf16>, vector<128x512xbf16>, vector<8x512xf32> -> vector<8x512xf32>
      %134 = arith.addf %131, %133 : vector<8x512xf32>
      %135 = vector.extract_strided_slice %134 {offsets = [0, 0], sizes = [8, 128], strides = [1, 1]} : vector<8x512xf32> to vector<8x128xf32>
      %136 = arith.negf %135 : vector<8x128xf32>
      %137 = math.exp %136 : vector<8x128xf32>
      %cst_34 = arith.constant 1.000000e+00 : f32
      %138 = vector.broadcast %cst_34 : f32 to vector<8x128xf32>
      %139 = arith.addf %138, %137 : vector<8x128xf32>
      %140 = arith.divf %138, %139 : vector<8x128xf32>
      %141 = vector.extract_strided_slice %134 {offsets = [0, 128], sizes = [8, 128], strides = [1, 1]} : vector<8x512xf32> to vector<8x128xf32>
      %142 = arith.negf %141 : vector<8x128xf32>
      %143 = math.exp %142 : vector<8x128xf32>
      %cst_35 = arith.constant 1.000000e+00 : f32
      %144 = vector.broadcast %cst_35 : f32 to vector<8x128xf32>
      %145 = arith.addf %144, %143 : vector<8x128xf32>
      %146 = arith.divf %144, %145 : vector<8x128xf32>
      %147 = vector.extract_strided_slice %134 {offsets = [0, 256], sizes = [8, 128], strides = [1, 1]} : vector<8x512xf32> to vector<8x128xf32>
      %148 = math.tanh %147 : vector<8x128xf32>
      %149 = vector.extract_strided_slice %134 {offsets = [0, 384], sizes = [8, 128], strides = [1, 1]} : vector<8x512xf32> to vector<8x128xf32>
      %150 = arith.negf %149 : vector<8x128xf32>
      %151 = math.exp %150 : vector<8x128xf32>
      %cst_36 = arith.constant 1.000000e+00 : f32
      %152 = vector.broadcast %cst_36 : f32 to vector<8x128xf32>
      %153 = arith.addf %152, %151 : vector<8x128xf32>
      %154 = arith.divf %152, %153 : vector<8x128xf32>
      %155 = arith.mulf %146, %128 : vector<8x128xf32>
      %156 = arith.mulf %140, %148 : vector<8x128xf32>
      %157 = arith.addf %155, %156 : vector<8x128xf32>
      %158 = math.tanh %157 : vector<8x128xf32>
      %159 = arith.mulf %154, %158 : vector<8x128xf32>
      %c40 = arith.constant 40 : index
      %c0_37 = arith.constant 0 : index
      %160 = vector.load %arg8[%c40, %c0_37] : memref<64x512xf32, #tpu.memory_space<vmem>>, vector<8x512xf32>
      %161 = arith.truncf %159 : vector<8x128xf32> to vector<8x128xbf16>
      %cst_38 = arith.constant dense<0.000000e+00> : vector<8x512xf32>
      %162 = tpu.matmul %161, %12, %cst_38 {dimension_numbers = #tpu.dot_dimension_numbers<[1], [0], [0], [1], [0, 0, 1, 1], [], []>} : vector<8x128xbf16>, vector<128x512xbf16>, vector<8x512xf32> -> vector<8x512xf32>
      %163 = arith.addf %160, %162 : vector<8x512xf32>
      %164 = vector.extract_strided_slice %163 {offsets = [0, 0], sizes = [8, 128], strides = [1, 1]} : vector<8x512xf32> to vector<8x128xf32>
      %165 = arith.negf %164 : vector<8x128xf32>
      %166 = math.exp %165 : vector<8x128xf32>
      %cst_39 = arith.constant 1.000000e+00 : f32
      %167 = vector.broadcast %cst_39 : f32 to vector<8x128xf32>
      %168 = arith.addf %167, %166 : vector<8x128xf32>
      %169 = arith.divf %167, %168 : vector<8x128xf32>
      %170 = vector.extract_strided_slice %163 {offsets = [0, 128], sizes = [8, 128], strides = [1, 1]} : vector<8x512xf32> to vector<8x128xf32>
      %171 = arith.negf %170 : vector<8x128xf32>
      %172 = math.exp %171 : vector<8x128xf32>
      %cst_40 = arith.constant 1.000000e+00 : f32
      %173 = vector.broadcast %cst_40 : f32 to vector<8x128xf32>
      %174 = arith.addf %173, %172 : vector<8x128xf32>
      %175 = arith.divf %173, %174 : vector<8x128xf32>
      %176 = vector.extract_strided_slice %163 {offsets = [0, 256], sizes = [8, 128], strides = [1, 1]} : vector<8x512xf32> to vector<8x128xf32>
      %177 = math.tanh %176 : vector<8x128xf32>
      %178 = vector.extract_strided_slice %163 {offsets = [0, 384], sizes = [8, 128], strides = [1, 1]} : vector<8x512xf32> to vector<8x128xf32>
      %179 = arith.negf %178 : vector<8x128xf32>
      %180 = math.exp %179 : vector<8x128xf32>
      %cst_41 = arith.constant 1.000000e+00 : f32
      %181 = vector.broadcast %cst_41 : f32 to vector<8x128xf32>
      %182 = arith.addf %181, %180 : vector<8x128xf32>
      %183 = arith.divf %181, %182 : vector<8x128xf32>
      %184 = arith.mulf %175, %157 : vector<8x128xf32>
      %185 = arith.mulf %169, %177 : vector<8x128xf32>
      %186 = arith.addf %184, %185 : vector<8x128xf32>
      %187 = math.tanh %186 : vector<8x128xf32>
      %188 = arith.mulf %183, %187 : vector<8x128xf32>
      %c48 = arith.constant 48 : index
      %c0_42 = arith.constant 0 : index
      %189 = vector.load %arg8[%c48, %c0_42] : memref<64x512xf32, #tpu.memory_space<vmem>>, vector<8x512xf32>
      %190 = arith.truncf %188 : vector<8x128xf32> to vector<8x128xbf16>
      %cst_43 = arith.constant dense<0.000000e+00> : vector<8x512xf32>
      %191 = tpu.matmul %190, %12, %cst_43 {dimension_numbers = #tpu.dot_dimension_numbers<[1], [0], [0], [1], [0, 0, 1, 1], [], []>} : vector<8x128xbf16>, vector<128x512xbf16>, vector<8x512xf32> -> vector<8x512xf32>
      %192 = arith.addf %189, %191 : vector<8x512xf32>
      %193 = vector.extract_strided_slice %192 {offsets = [0, 0], sizes = [8, 128], strides = [1, 1]} : vector<8x512xf32> to vector<8x128xf32>
      %194 = arith.negf %193 : vector<8x128xf32>
      %195 = math.exp %194 : vector<8x128xf32>
      %cst_44 = arith.constant 1.000000e+00 : f32
      %196 = vector.broadcast %cst_44 : f32 to vector<8x128xf32>
      %197 = arith.addf %196, %195 : vector<8x128xf32>
      %198 = arith.divf %196, %197 : vector<8x128xf32>
      %199 = vector.extract_strided_slice %192 {offsets = [0, 128], sizes = [8, 128], strides = [1, 1]} : vector<8x512xf32> to vector<8x128xf32>
      %200 = arith.negf %199 : vector<8x128xf32>
      %201 = math.exp %200 : vector<8x128xf32>
      %cst_45 = arith.constant 1.000000e+00 : f32
      %202 = vector.broadcast %cst_45 : f32 to vector<8x128xf32>
      %203 = arith.addf %202, %201 : vector<8x128xf32>
      %204 = arith.divf %202, %203 : vector<8x128xf32>
      %205 = vector.extract_strided_slice %192 {offsets = [0, 256], sizes = [8, 128], strides = [1, 1]} : vector<8x512xf32> to vector<8x128xf32>
      %206 = math.tanh %205 : vector<8x128xf32>
      %207 = vector.extract_strided_slice %192 {offsets = [0, 384], sizes = [8, 128], strides = [1, 1]} : vector<8x512xf32> to vector<8x128xf32>
      %208 = arith.negf %207 : vector<8x128xf32>
      %209 = math.exp %208 : vector<8x128xf32>
      %cst_46 = arith.constant 1.000000e+00 : f32
      %210 = vector.broadcast %cst_46 : f32 to vector<8x128xf32>
      %211 = arith.addf %210, %209 : vector<8x128xf32>
      %212 = arith.divf %210, %211 : vector<8x128xf32>
      %213 = arith.mulf %204, %186 : vector<8x128xf32>
      %214 = arith.mulf %198, %206 : vector<8x128xf32>
      %215 = arith.addf %213, %214 : vector<8x128xf32>
      %216 = math.tanh %215 : vector<8x128xf32>
      %217 = arith.mulf %212, %216 : vector<8x128xf32>
      %c56 = arith.constant 56 : index
      %c0_47 = arith.constant 0 : index
      %218 = vector.load %arg8[%c56, %c0_47] : memref<64x512xf32, #tpu.memory_space<vmem>>, vector<8x512xf32>
      %219 = arith.truncf %217 : vector<8x128xf32> to vector<8x128xbf16>
      %cst_48 = arith.constant dense<0.000000e+00> : vector<8x512xf32>
      %220 = tpu.matmul %219, %12, %cst_48 {dimension_numbers = #tpu.dot_dimension_numbers<[1], [0], [0], [1], [0, 0, 1, 1], [], []>} : vector<8x128xbf16>, vector<128x512xbf16>, vector<8x512xf32> -> vector<8x512xf32>
      %221 = arith.addf %218, %220 : vector<8x512xf32>
      %222 = vector.extract_strided_slice %221 {offsets = [0, 0], sizes = [8, 128], strides = [1, 1]} : vector<8x512xf32> to vector<8x128xf32>
      %223 = arith.negf %222 : vector<8x128xf32>
      %224 = math.exp %223 : vector<8x128xf32>
      %cst_49 = arith.constant 1.000000e+00 : f32
      %225 = vector.broadcast %cst_49 : f32 to vector<8x128xf32>
      %226 = arith.addf %225, %224 : vector<8x128xf32>
      %227 = arith.divf %225, %226 : vector<8x128xf32>
      %228 = vector.extract_strided_slice %221 {offsets = [0, 128], sizes = [8, 128], strides = [1, 1]} : vector<8x512xf32> to vector<8x128xf32>
      %229 = arith.negf %228 : vector<8x128xf32>
      %230 = math.exp %229 : vector<8x128xf32>
      %cst_50 = arith.constant 1.000000e+00 : f32
      %231 = vector.broadcast %cst_50 : f32 to vector<8x128xf32>
      %232 = arith.addf %231, %230 : vector<8x128xf32>
      %233 = arith.divf %231, %232 : vector<8x128xf32>
      %234 = vector.extract_strided_slice %221 {offsets = [0, 256], sizes = [8, 128], strides = [1, 1]} : vector<8x512xf32> to vector<8x128xf32>
      %235 = math.tanh %234 : vector<8x128xf32>
      %236 = vector.extract_strided_slice %221 {offsets = [0, 384], sizes = [8, 128], strides = [1, 1]} : vector<8x512xf32> to vector<8x128xf32>
      %237 = arith.negf %236 : vector<8x128xf32>
      %238 = math.exp %237 : vector<8x128xf32>
      %cst_51 = arith.constant 1.000000e+00 : f32
      %239 = vector.broadcast %cst_51 : f32 to vector<8x128xf32>
      %240 = arith.addf %239, %238 : vector<8x128xf32>
      %241 = arith.divf %239, %240 : vector<8x128xf32>
      %242 = arith.mulf %233, %215 : vector<8x128xf32>
      %243 = arith.mulf %227, %235 : vector<8x128xf32>
      %244 = arith.addf %242, %243 : vector<8x128xf32>
      %245 = math.tanh %244 : vector<8x128xf32>
      %246 = arith.mulf %241, %245 : vector<8x128xf32>
      %c0_52 = arith.constant 0 : index
      %c0_53 = arith.constant 0 : index
      %247 = vector.load %arg5[%c0_52, %c0_53] : memref<128x8xf32, #tpu.memory_space<vmem>>, vector<128x8xf32>
      %cst_54 = arith.constant dense<0.000000e+00> : vector<8x8xf32>
      %248 = tpu.matmul %246, %247, %cst_54 {dimension_numbers = #tpu.dot_dimension_numbers<[1], [0], [0], [1], [0, 0, 1, 1], [], []>} : vector<8x128xf32>, vector<128x8xf32>, vector<8x8xf32> -> vector<8x8xf32>
      %c0_55 = arith.constant 0 : index
      %c0_56 = arith.constant 0 : index
      %249 = vector.load %arg6[%c0_55, %c0_56] : memref<1x8xf32, #tpu.memory_space<vmem>>, vector<1x8xf32>
      %250 = vector.broadcast %249 : vector<1x8xf32> to vector<8x8xf32>
      %251 = arith.addf %248, %250 : vector<8x8xf32>
      %c0_57 = arith.constant 0 : index
      %c0_58 = arith.constant 0 : index
      %252 = vector.load %arg7[%c0_57, %c0_58] : memref<8x8xf32, #tpu.memory_space<vmem>>, vector<8x8xf32>
      tpu.vector_store %arg7[%c0_57, %c0_58], %251 {strides = array<i32>} : memref<8x8xf32, #tpu.memory_space<vmem>>, vector<8x8xf32>,
    } else {
    }
    return
  }
  func.func @transform_0(%arg0: i32) -> (i32, i32) {
    %c0_i32 = arith.constant 0 : i32
    %c0_i32_0 = arith.constant 0 : i32
    return %c0_i32, %arg0 : i32, i32
  }
  func.func @transform_1(%arg0: i32) -> (i32, i32) {
    %c0_i32 = arith.constant 0 : i32
    %c0_i32_0 = arith.constant 0 : i32
    return %arg0, %c0_i32 : i32, i32
  }
  func.func @transform_2(%arg0: i32) -> (i32, i32) {
    %c0_i32 = arith.constant 0 : i32
    %c0_i32_0 = arith.constant 0 : i32
    %c0_i32_1 = arith.constant 0 : i32
    return %c0_i32, %c0_i32_0 : i32, i32
  }
  func.func @transform_3(%arg0: i32) -> (i32, i32) {
    %c0_i32 = arith.constant 0 : i32
    %c0_i32_0 = arith.constant 0 : i32
    %c0_i32_1 = arith.constant 0 : i32
    return %c0_i32, %c0_i32_0 : i32, i32
  }
  func.func @transform_4(%arg0: i32) -> (i32, i32) {
    %c0_i32 = arith.constant 0 : i32
    %c0_i32_0 = arith.constant 0 : i32
    %c0_i32_1 = arith.constant 0 : i32
    return %c0_i32, %c0_i32_0 : i32, i32
  }
  func.func @transform_5(%arg0: i32) -> (i32, i32) {
    %c0_i32 = arith.constant 0 : i32
    %c0_i32_0 = arith.constant 0 : i32
    %c0_i32_1 = arith.constant 0 : i32
    return %c0_i32, %c0_i32_0 : i32, i32
  }
  func.func @transform_6(%arg0: i32) -> (i32, i32) {
    %c0_i32 = arith.constant 0 : i32
    %c0_i32_0 = arith.constant 0 : i32
    %c0_i32_1 = arith.constant 0 : i32
    return %c0_i32, %c0_i32_0 : i32, i32
  }
}

</mosaic_0001>

<bundles_post_ra>
// kernel: tpu_custom_call.1
= control target key start
LH: loop header
LB: loop body
LE: loop exit
PB: predicated region body
PF: predicated region fallthrough
CT: control target
= control target key end

     0   :  { %s5056_s0 = inlined_call_operand.hbm [shape: bf16[64,2048], index: 0, kind: input, shape index: {}]   ;;  %s5057_s1 = inlined_call_operand.hbm [shape: bf16[2048,512], index: 1, kind: input, shape index: {}]   ;;  %s5058_s2 = inlined_call_operand.hbm [shape: bf16[128,512], index: 2, kind: input, shape index: {}]   ;;  %s5059_s3 = inlined_call_operand.hbm [shape: f32[1,512], index: 3, kind: input, shape index: {}]   ;;  %s5060_s4 = inlined_call_operand.vmem [shape: f32[128,8], index: 4, kind: input, shape index: {}]   ;;  %s5061_s5 = inlined_call_operand.hbm [shape: f32[1,8], index: 5, kind: input, shape index: {}]   ;;  %s5062_s6 = inlined_call_operand.hbm [shape: f32[8,8], index: 6, kind: output, shape index: {}]  }
   0x1   :  { %5070 = sst [smem:[#allocation20_spill]] %s5062_s6 }
   0x2   :  { %11 = vsyncpa [#allocation4], 0 }
   0x3   :  { %13 = vsyncpa [#allocation4 + $0x1], 0 }
   0x4   :  { %14 = vsyncpa [#allocation7], 0 }
   0x5   :  { %16 = vsyncpa [#allocation7 + $0x1], 0 }
   0x6   :  { %17 = vsyncpa [#allocation10], 0 }
   0x7   :  { %18 = vsyncpa [#allocation5], 0  ;;  %s4125_s21 = smov 0   ;;  %s4127_s22 = smov 0  }
   0x8   :  { %s4129_s23 = smov 0   ;;  %s4131_s24 = smov 0  }
   0x9 LB: > { %s4144_s25 = sadd.s32 4294967295, %s4075_s24   ;;  %s4147_s26 = sadd.s32 1, %s4075_s24   ;;  %s4075_s24 = sphi %s4131_s24, %s5089_s24   ;;  %s4071_s23 = sphi %s4129_s23, %s5093_s23   ;;  %s4067_s22 = sphi %s4127_s22, %s5092_s22   ;;  %s4063_s21 = sphi %s4125_s21, %s5091_s21  }
   0xa   : > { %5071 = sst [smem:[#allocation18_spill]] %s4147_s26  ;;  %s28_s27 = ssub.s32 %s4075_s24, %s4147_s26 }
   0xb   : > { %s31_s28 = sadd.s32 1, %s4071_s23  ;;  %p29_p0 = scmp.eq.s32.totalorder %s28_s27, 0 }
   0xc   : > { %p38_p1 = scmp.ne.s32.totalorder %s4071_s23, %s4067_s22  ;;  %p39_p2 = scmp.eq.s32.totalorder %s4075_s24, 0 }
   0xd   : > { %p44_p3 = scmp.ne.s32.totalorder %s4067_s22, %s4063_s21  ;;  %p5063_p5 = scmp.eq.s32.totalorder %s4144_s25, 0 }
   0xe   : > { %s4157_s29 = scalar_select %p29_p0, %s4071_s23, %s31_s28  }
   0xf   : > { %p4159_p4 = por %p39_p2, %p38_p1  ;;  %p3006_p6 = scmp.ge.s32.totalorder %s4075_s24, 1 }
  0x10   : > { %5072 = sst [smem:[#allocation19_spill]] %s4157_s29  ;;  %p186_p7 = scmp.lt.s32.totalorder %s4075_s24, 5 }
  0x11   : > { %p4168_p8 = por %p5063_p5, %p44_p3  ;;  %s4077_s9 = smov [#allocation8]  }
  0x12   : > { %p4173_p10 = pnand %p3006_p6, %p186_p7  ;;  %s198_s10 = sshll.u32 %s4077_s9, 4  ;;  %s199_s10 = int_to_ptr.vmem [resolvable:$true] %s198_s10 }
  0x13   : > { %s5074_s7 = scalar_select %p4168_p8, 1, 0 }
  0x14   : > { %s5075_s8 = scalar_select %p4173_p10, 1, 0 }
  0x15   : > { %p3363_p11 = pneg %p4173_p10  ;;  %p3383_p13 = scmp.lt.s32.totalorder %s4075_s24, 4 }
  0x16   : > { %s3855_s15 = scalar_lea.hbm %s5058_s2, 4096 }
  0x17   : > { %p4181_p12 = pnand %p3363_p11, %p5063_p5  ;;  %p4188_p0 = pnand %p3383_p13, %p4159_p4 }
  0x18   : > { %p3856_p1 = scmp.ne.s32.totalorder %s5058_s2, %s3855_s15  ;;  %p3862_p6 = scmp.lt.u32.totalorder %s3855_s15, %s5058_s2 }
  0x19   : > { %s5077_s12 = scalar_select %p4188_p0, 1, 0 }
  0x1a   : > { %p4200_p2 = pneg %p4181_p12 }
  0x1c   : > { %p3858_p3 = pnand %p4200_p2, %p3856_p1 }
  0x1e   : > { %p3859_p4 = pneg %p3858_p3 }
  0x20   : > { %p3864_p7 = pnand %p3862_p6, %p3859_p4 }
  0x22   : > { %3867 = shalt.err (!%p3864_p7)
}
  0x23   : > { %s3868_s21 = scalar_lea.vmem %s199_s10, 4096  ;;  %p3876_p5 = scmp.lt.s32.totalorder %s199_s10, %s199_s10 }
  0x24   : > { %p3869_p11 = scmp.ne.s32.totalorder %s199_s10, %s3868_s21  ;;  %p3877_p8 = scmp.lt.s32.totalorder %s3868_s21, %s3868_s21 }
  0x26   : > { %p3871_p13 = pnand %p3869_p11, %p4200_p2  ;;  %p3878_p10 = por %p3877_p8, %p3876_p5 }
  0x28   : > { %p3872_p9 = pneg %p3871_p13 }
  0x2a   : > { %p3879_p0 = pnand %p3878_p10, %p3872_p9 }
  0x2c   : > { %3882 = shalt.err (!%p3879_p0)
}
  0x2d   : > { %s4078_s27 = smov 256   ;;  %s4079_s28 = smov 16  }
  0x2e   : > { %3366 = dma.hbm_to_vmem [thread:$0]  (!%p4181_p12), %s5058_s2, 4096, %s199_s10, [#allocation7], %s4078_s27, %s4078_s27, %s4079_s28  }
  0x2f   : > { %s4080_s13 = smov [#allocation9]   ;;  %s4081_s15 = smov [#allocation11]  }
  0x30   : > { %s212_s14 = sshll.u32 %s4080_s13, 4  ;;  %s226_s16 = sshll.u32 %s4081_s15, 4  ;;  %s213_s14 = int_to_ptr.vmem [resolvable:$true] %s212_s14  ;;  %s227_s16 = int_to_ptr.vmem [resolvable:$true] %s226_s16 }
  0x31   : > { %s3883_s20 = scalar_lea.hbm %s5059_s3, 64 }
  0x32   : > { %p3884_p5 = scmp.ne.s32.totalorder %s5059_s3, %s3883_s20  ;;  %p3890_p10 = scmp.lt.u32.totalorder %s3883_s20, %s5059_s3 }
  0x34   : > { %p3886_p8 = pnand %p3884_p5, %p4200_p2 }
  0x36   : > { %p3887_p9 = pneg %p3886_p8 }
  0x38   : > { %p3892_p0 = pnand %p3890_p10, %p3887_p9 }
  0x3a   : > { %3895 = shalt.err (!%p3892_p0)
}
  0x3b   : > { %s3896_s10 = scalar_lea.vmem %s213_s14, 64  ;;  %p3904_p6 = scmp.lt.s32.totalorder %s213_s14, %s213_s14 }
  0x3c   : > { %p3897_p1 = scmp.ne.s32.totalorder %s213_s14, %s3896_s10  ;;  %p3905_p7 = scmp.lt.s32.totalorder %s3896_s10, %s3896_s10 }
  0x3e   : > { %p3899_p3 = pnand %p3897_p1, %p4200_p2  ;;  %p3906_p11 = por %p3905_p7, %p3904_p6 }
  0x40   : > { %p3900_p4 = pneg %p3899_p3 }
  0x42   : > { %p3907_p13 = pnand %p3906_p11, %p3900_p4 }
  0x44   : > { %3910 = shalt.err (!%p3907_p13)
}
  0x45   : > { %3369 = dma.hbm_to_vmem [thread:$0]  (!%p4181_p12), %s5059_s3, 64, %s213_s14, [#allocation10]  }
  0x46   : > { %s4238_s6 = sand.u32 1, %s4071_s23   ;;  %s3911_s13 = scalar_lea.hbm %s5061_s5, 16 }
  0x47   : > { %p3912_p5 = scmp.ne.s32.totalorder %s5061_s5, %s3911_s13  ;;  %p3918_p10 = scmp.lt.u32.totalorder %s3911_s13, %s5061_s5 }
  0x49   : > { %p3914_p8 = pnand %p3912_p5, %p4200_p2 }
  0x4b   : > { %p3915_p9 = pneg %p3914_p8 }
  0x4d   : > { %p3920_p0 = pnand %p3918_p10, %p3915_p9 }
  0x4f   : > { %3923 = shalt.err (!%p3920_p0)
}
  0x50   : > { %s3924_s14 = scalar_lea.vmem %s227_s16, 16  ;;  %s3931_s21 = scalar_lea.vmem %s227_s16, 32 }
  0x51   : > { %p3925_p1 = scmp.ne.s32.totalorder %s227_s16, %s3924_s14  ;;  %p3932_p6 = scmp.lt.s32.totalorder %s227_s16, %s227_s16 }
  0x52   : > { %p3933_p7 = scmp.lt.s32.totalorder %s3931_s21, %s3924_s14 }
  0x53   : > { %p3927_p3 = pnand %p3925_p1, %p4200_p2 }
  0x54   : > { %p3934_p11 = por %p3933_p7, %p3932_p6 }
  0x55   : > { %p3928_p4 = pneg %p3927_p3 }
  0x57   : > { %p3935_p13 = pnand %p3934_p11, %p3928_p4 }
  0x59   : > { %3938 = shalt.err (!%p3935_p13)
}
  0x5a   : > { %3372 = dma.hbm_to_vmem [thread:$0]  (!%p4181_p12), %s5061_s5, 16, %s227_s16, [#allocation10]  }
  0x5b   : > { %s3011_s18 = sshll.u32 %s4238_s6, 7  ;;  %s3232_s30 = sshll.u32 %s4075_s24, 8 }
  0x5c   : > { %s4263_s13 = scalar_lea.hbm %s5056_s0, %s3232_s30  ;;  %s241_s11 = scalar_lea.vmem [#allocation3], %s3011_s18 }
  0x5d   : > { %s248_s15 = sshll.u32 %s241_s11, 4  ;;  %s238_s17 = scalar_lea.sflag [#allocation4], %s4238_s6  ;;  %s4265_s15 = int_to_ptr.vmem [resolvable:$true] %s248_s15 }
  0x5e   : > { %s3939_s19 = scalar_lea.hbm %s4263_s13, 2048  ;;  %p5079_p5 = scmp.ne.s32.totalorder %s5077_s12, 0 }
  0x5f   : > { %p3940_p2 = scmp.ne.s32.totalorder %s4263_s13, %s3939_s19  ;;  %s3944_s14 = scalar_lea.hbm %s5056_s0, 8192 }
  0x60   : > { %p3941_p12 = pneg %p5079_p5  ;;  %p3945_p10 = scmp.lt.u32.totalorder %s4263_s13, %s5056_s0 }
  0x61   : > { %p3946_p0 = scmp.lt.u32.totalorder %s3944_s14, %s3939_s19  ;;  %p3948_p3 = scmp.lt.u32.totalorder %s3939_s19, %s4263_s13 }
  0x62   : > { %p3942_p8 = pnand %p3941_p12, %p3940_p2 }
  0x63   : > { %p3947_p1 = por %p3946_p0, %p3945_p10 }
  0x64   : > { %p3943_p9 = pneg %p3942_p8 }
  0x65   : > { %p3949_p4 = por %p3948_p3, %p3947_p1 }
  0x67   : > { %p3950_p6 = pnand %p3949_p4, %p3943_p9 }
  0x69   : > { %3953 = shalt.err (!%p3950_p6)
}
  0x6a   : > { %s3954_s29 = scalar_lea.vmem %s4265_s15, 2048  ;;  %s4082_s18 = smov [#allocation3]  }
  0x6b   : > { %p3955_p7 = scmp.ne.s32.totalorder %s4265_s15, %s3954_s29  ;;  %s3959_s30 = sshll.u32 %s4082_s18, 4  ;;  %s3960_s30 = int_to_ptr.vmem [resolvable:$false] %s3959_s30 }
  0x6c   : > { %s3961_s26 = scalar_lea.vmem %s3960_s30, 4096  ;;  %p3962_p2 = scmp.lt.s32.totalorder %s4265_s15, %s3960_s30 }
  0x6d   : > { %p3957_p11 = pnand %p3955_p7, %p3941_p12  ;;  %p3963_p8 = scmp.lt.s32.totalorder %s3961_s26, %s3954_s29 }
  0x6f   : > { %p3958_p13 = pneg %p3957_p11  ;;  %p3964_p10 = por %p3963_p8, %p3962_p2 }
  0x71   : > { %p3965_p0 = pnand %p3964_p10, %p3958_p13 }
  0x73   : > { %3968 = shalt.err (!%p3965_p0)
}
  0x74   : > { %s4083_s9 = smov 1024   ;;  %s258_s11 = sand.u32 1, %s4075_s24  }
  0x75   : > { %3376 = dma.hbm_to_vmem [thread:$0]  (!%p5079_p5), %s4263_s13, 2048, %s4265_s15, %s238_s17, %s4083_s9, %s4078_s27, %s4079_s28  }
  0x76   : > { %s3014_s19 = sshll.u32 %s4238_s6, 10  ;;  %s3234_s16 = sshll.u32 %s4075_s24, 14 }
  0x77   : > { %s262_s20 = scalar_lea.vmem [#allocation6], %s3014_s19  ;;  %s4303_s29 = scalar_lea.hbm %s5057_s1, %s3234_s16 }
  0x78   : > { %s270_s14 = sshll.u32 %s262_s20, 4  ;;  %s4307_s18 = scalar_lea.sflag [#allocation7], %s258_s11  ;;  %s4305_s14 = int_to_ptr.vmem [resolvable:$true] %s270_s14 }
  0x79   : > { %s3969_s30 = scalar_lea.hbm %s4303_s29, 16384  ;;  %s3974_s13 = scalar_lea.hbm %s5057_s1, 65536 }
  0x7a   : > { %p3970_p9 = scmp.ne.s32.totalorder %s4303_s29, %s3969_s30  ;;  %p3975_p4 = scmp.lt.u32.totalorder %s4303_s29, %s5057_s1 }
  0x7b   : > { %p3976_p6 = scmp.lt.u32.totalorder %s3974_s13, %s3969_s30  ;;  %p3978_p11 = scmp.lt.u32.totalorder %s3969_s30, %s4303_s29 }
  0x7c   : > { %p3972_p1 = pnand %p3970_p9, %p3941_p12 }
  0x7d   : > { %p3977_p7 = por %p3976_p6, %p3975_p4 }
  0x7e   : > { %p3973_p3 = pneg %p3972_p1 }
  0x7f   : > { %p3979_p13 = por %p3978_p11, %p3977_p7 }
  0x81   : > { %p3980_p2 = pnand %p3979_p13, %p3973_p3 }
  0x83   : > { %3983 = shalt.err (!%p3980_p2)
}
  0x84   : > { %s3984_s26 = scalar_lea.vmem %s4305_s14, 16384  ;;  %s4084_s9 = smov [#allocation6]  }
  0x85   : > { %p3985_p8 = scmp.ne.s32.totalorder %s4305_s14, %s3984_s26  ;;  %s3989_s11 = sshll.u32 %s4084_s9, 4  ;;  %s3990_s11 = int_to_ptr.vmem [resolvable:$false] %s3989_s11 }
  0x86   : > { %s3991_s19 = scalar_lea.vmem %s3990_s11, 32768  ;;  %p3992_p9 = scmp.lt.s32.totalorder %s4305_s14, %s3990_s11 }
  0x87   : > { %p3987_p10 = pnand %p3985_p8, %p3941_p12  ;;  %p3993_p1 = scmp.lt.s32.totalorder %s3991_s19, %s3984_s26 }
  0x89   : > { %p3988_p0 = pneg %p3987_p10  ;;  %p3994_p4 = por %p3993_p1, %p3992_p9 }
  0x8b   : > { %p3995_p6 = pnand %p3994_p4, %p3988_p0 }
  0x8d   : > { %3998 = shalt.err (!%p3995_p6)
}
  0x8e   : > { %3379 = dma.hbm_to_vmem [thread:$0]  (!%p5079_p5), %s4303_s29, 16384, %s4305_s14, %s4307_s18, %s4078_s27, %s4078_s27, %s4079_s28  }
  0x8f   : > { %p5080_p12 = scmp.ne.s32.totalorder %s5075_s8, 0 }
  0x90   : > { %s284_s16 = sand.u32 (!%p5080_p12), 1, %s4067_s22   ;;  %p5081_p3 = scmp.ne.s32.totalorder (!%p5080_p12), %s5074_s7, 0 }
  0x91   : > { %282 = sbr.rel (%p5080_p12) target bundleno = 2912 (0xb60), region = 44  ;;  %s3019_s20 = sshll.u32 (!%p5080_p12), %s284_s16, 7 }
  0x92   : > { %s285_s21 = scalar_lea.sflag (!%p5080_p12), [#allocation4], %s284_s16  ;;  %s4339_s10 = scalar_lea.vmem (!%p5080_p12), [#allocation3], %s3019_s20 }
  0x98   : > { %4042 = dma.done.wait (%p5081_p3), %s285_s21, 2048  }
  0x99   : > { %4044 = vsyncadd (%p5081_p3), %s285_s21, 4294965248  ;;  %s293_s12 = sand.u32 1, %s4144_s25   ;;  %s3020_s30 = sshll.u32 %s284_s16, 10 }
  0x9a   : > { %s294_s27 = scalar_lea.sflag [#allocation7], %s293_s12  ;;  %s4346_s28 = scalar_lea.vmem [#allocation6], %s3020_s30 }
  0x9b   : > { %4046 = dma.done.wait (%p5081_p3), %s294_s27, 16384  }
  0x9c   : > { %4048 = vsyncadd (%p5081_p3), %s294_s27, 4294950912  ;;  %p5082_p5 = scmp.eq.s32.totalorder %s4144_s25, 0 }
  0x9e   : > { %4050 = dma.done.wait (%p5082_p5), [#allocation7], 4096   ;;  %p5083_p7 = pmov %p5082_p5 }
  0x9f   : > { %p5084_p11 = pmov %p5082_p5 }
  0xa0   : > { %4052 = vsyncadd (%p5083_p7), [#allocation7], 4294963200 }
  0xa1   : > { %4054 = dma.done.wait (%p5084_p11), [#allocation10], 80   ;;  %p5085_p13 = pmov %p5082_p5 }
  0xa2   : > { %v3432_v0 = vld [vmem:[%s4346_s28 + $0x4] ss:$16 sps:$4 sm:$0xff]   ;;  %v3434_v1 = vld [vmem:[%s4346_s28 + $0xc] ss:$16 sps:$4 sm:$0xff]   ;;  %v3436_v2 = vld [vmem:[%s4346_s28] ss:$16 sps:$4 sm:$0xff]  }
  0xa3   : > { %4056 = vsyncadd (%p5085_p13), [#allocation10], 4294967216  ;;  %1205 = vmatprep.subr.bf16.mxu0 %v3432_v0  ;;  %v3437_v3 = vld [vmem:[%s4346_s28 + $0x8] ss:$16 sps:$4 sm:$0xff]   ;;  %1351 = vmatprep.subr.bf16.mxu1 %v3434_v1  ;;  %v3438_v4 = vld [vmem:[%s4346_s28 + $0x24] ss:$16 sps:$4 sm:$0xff]  }
  0xa4   : > { %1206 = vmatpush1.bf16.msra.mxu0 %v3436_v2  ;;  %1352 = vmatpush1.bf16.msra.mxu1 %v3437_v3  ;;  %v3440_v5 = vld [vmem:[%s4346_s28 + $0x2c] ss:$16 sps:$4 sm:$0xff]   ;;  %v3442_v6 = vld [vmem:[%s4346_s28 + $0x20] ss:$16 sps:$4 sm:$0xff]   ;;  %v3443_v7 = vld [vmem:[%s4346_s28 + $0x28] ss:$16 sps:$4 sm:$0xff]  }
  0xa5   : > { %1207 = vmatprep.subr.bf16.mxu0 %v3438_v4  ;;  %1353 = vmatprep.subr.bf16.mxu1 %v3440_v5  ;;  %v3444_v8 = vld [vmem:[%s4346_s28 + $0x44] ss:$16 sps:$4 sm:$0xff]   ;;  %v3446_v9 = vld [vmem:[%s4346_s28 + $0x4c] ss:$16 sps:$4 sm:$0xff]   ;;  %v3448_v10 = vld [vmem:[%s4346_s28 + $0x40] ss:$16 sps:$4 sm:$0xff]  }
  0xa6   : > { %v3449_v11 = vld [vmem:[%s4346_s28 + $0x48] ss:$16 sps:$4 sm:$0xff]   ;;  %v3450_v12 = vld [vmem:[%s4346_s28 + $0x64] ss:$16 sps:$4 sm:$0xff]   ;;  %v3452_v13 = vld [vmem:[%s4346_s28 + $0x6c] ss:$16 sps:$4 sm:$0xff]  }
  0xa7   : > { %v3454_v14 = vld [vmem:[%s4346_s28 + $0x60] ss:$16 sps:$4 sm:$0xff]   ;;  %v3455_v15 = vld [vmem:[%s4346_s28 + $0x68] ss:$16 sps:$4 sm:$0xff]   ;;  %v3456_v16 = vld [vmem:[%s4346_s28 + $0x84] ss:$16 sps:$4 sm:$0xff]  }
  0xa8   : > { %1208 = vmatpush1.bf16.msra.mxu0 %v3442_v6  ;;  %1354 = vmatpush1.bf16.msra.mxu1 %v3443_v7  ;;  %v3458_v17 = vld [vmem:[%s4346_s28 + $0x8c] ss:$16 sps:$4 sm:$0xff]   ;;  %v3460_v18 = vld [vmem:[%s4346_s28 + $0x80] ss:$16 sps:$4 sm:$0xff]   ;;  %v3461_v19 = vld [vmem:[%s4346_s28 + $0x88] ss:$16 sps:$4 sm:$0xff]  }
  0xa9   : > { %1209 = vmatprep.subr.bf16.mxu0 %v3444_v8  ;;  %1355 = vmatprep.subr.bf16.mxu1 %v3446_v9  ;;  %v3462_v20 = vld [vmem:[%s4346_s28 + $0xa4] ss:$16 sps:$4 sm:$0xff]   ;;  %v3464_v21 = vld [vmem:[%s4346_s28 + $0xac] ss:$16 sps:$4 sm:$0xff]   ;;  %v3466_v22 = vld [vmem:[%s4346_s28 + $0xa0] ss:$16 sps:$4 sm:$0xff]  }
  0xaa   : > { %v3467_v23 = vld [vmem:[%s4346_s28 + $0xa8] ss:$16 sps:$4 sm:$0xff]   ;;  %v3468_v24 = vld [vmem:[%s4346_s28 + $0xc4] ss:$16 sps:$4 sm:$0xff]   ;;  %v3470_v25 = vld [vmem:[%s4346_s28 + $0xcc] ss:$16 sps:$4 sm:$0xff]  }
  0xab   : > { %v3472_v26 = vld [vmem:[%s4346_s28 + $0xc0] ss:$16 sps:$4 sm:$0xff]   ;;  %v3473_v27 = vld [vmem:[%s4346_s28 + $0xc8] ss:$16 sps:$4 sm:$0xff]   ;;  %v3474_v28 = vld [vmem:[%s4346_s28 + $0xe4] ss:$16 sps:$4 sm:$0xff]  }
  0xac   : > { %1210 = vmatpush1.bf16.msra.mxu0 %v3448_v10  ;;  %1356 = vmatpush1.bf16.msra.mxu1 %v3449_v11  ;;  %v3476_v29 = vld [vmem:[%s4346_s28 + $0xec] ss:$16 sps:$4 sm:$0xff]   ;;  %v3478_v30 = vld [vmem:[%s4346_s28 + $0xe0] ss:$16 sps:$4 sm:$0xff]   ;;  %v3479_v31 = vld [vmem:[%s4346_s28 + $0xe8] ss:$16 sps:$4 sm:$0xff]  }
  0xad   : > { %1211 = vmatprep.subr.bf16.mxu0 %v3450_v12  ;;  %1357 = vmatprep.subr.bf16.mxu1 %v3452_v13  ;;  %v3480_v32 = vld [vmem:[%s4346_s28 + $0x104] ss:$16 sps:$4 sm:$0xff]   ;;  %v3482_v33 = vld [vmem:[%s4346_s28 + $0x10c] ss:$16 sps:$4 sm:$0xff]   ;;  %v3484_v34 = vld [vmem:[%s4346_s28 + $0x100] ss:$16 sps:$4 sm:$0xff]  }
  0xae   : > { %v3485_v35 = vld [vmem:[%s4346_s28 + $0x108] ss:$16 sps:$4 sm:$0xff]   ;;  %v3486_v36 = vld [vmem:[%s4346_s28 + $0x124] ss:$16 sps:$4 sm:$0xff]   ;;  %v3488_v37 = vld [vmem:[%s4346_s28 + $0x12c] ss:$16 sps:$4 sm:$0xff]  }
  0xaf   : > { %v3490_v38 = vld [vmem:[%s4346_s28 + $0x120] ss:$16 sps:$4 sm:$0xff]   ;;  %v3491_v39 = vld [vmem:[%s4346_s28 + $0x128] ss:$16 sps:$4 sm:$0xff]   ;;  %v3492_v40 = vld [vmem:[%s4346_s28 + $0x144] ss:$16 sps:$4 sm:$0xff]  }
  0xb0   : > { %1212 = vmatpush1.bf16.msra.mxu0 %v3454_v14  ;;  %1358 = vmatpush1.bf16.msra.mxu1 %v3455_v15  ;;  %v3494_v41 = vld [vmem:[%s4346_s28 + $0x14c] ss:$16 sps:$4 sm:$0xff]   ;;  %v3496_v42 = vld [vmem:[%s4346_s28 + $0x140] ss:$16 sps:$4 sm:$0xff]   ;;  %v3497_v43 = vld [vmem:[%s4346_s28 + $0x148] ss:$16 sps:$4 sm:$0xff]  }
  0xb1   : > { %1213 = vmatprep.subr.bf16.mxu0 %v3456_v16  ;;  %1359 = vmatprep.subr.bf16.mxu1 %v3458_v17  ;;  %v3498_v44 = vld [vmem:[%s4346_s28 + $0x164] ss:$16 sps:$4 sm:$0xff]   ;;  %v3500_v45 = vld [vmem:[%s4346_s28 + $0x16c] ss:$16 sps:$4 sm:$0xff]   ;;  %v3502_v46 = vld [vmem:[%s4346_s28 + $0x160] ss:$16 sps:$4 sm:$0xff]  }
  0xb2   : > { %v3503_v47 = vld [vmem:[%s4346_s28 + $0x168] ss:$16 sps:$4 sm:$0xff]   ;;  %v3530_v48 = vld [vmem:[%s4339_s10 + $0x4] ss:$16 sps:$4 sm:$0xff]   ;;  %v3506_v50 = vld [vmem:[%s4346_s28 + $0x18c] ss:$16 sps:$4 sm:$0xff]  }
  0xb3   : > { %v3504_v49 = vld [vmem:[%s4346_s28 + $0x184] ss:$16 sps:$4 sm:$0xff]   ;;  %1237 = vmatprep.mubr.bf16.mxu0 %v3530_v48  ;;  %1383 = vmatprep.mubr.bf16.mxu1 %v3530_v48  ;;  %v3508_v51 = vld [vmem:[%s4346_s28 + $0x180] ss:$16 sps:$4 sm:$0xff]   ;;  %v3509_v52 = vld [vmem:[%s4346_s28 + $0x188] ss:$16 sps:$4 sm:$0xff]  }
  0xb4   : > { %1214 = vmatpush1.bf16.msra.mxu0 %v3460_v18  ;;  %1360 = vmatpush1.bf16.msra.mxu1 %v3461_v19  ;;  %v3510_v53 = vld [vmem:[%s4346_s28 + $0x1a4] ss:$16 sps:$4 sm:$0xff]   ;;  %v3512_v54 = vld [vmem:[%s4346_s28 + $0x1ac] ss:$16 sps:$4 sm:$0xff]   ;;  %v3514_v55 = vld [vmem:[%s4346_s28 + $0x1a0] ss:$16 sps:$4 sm:$0xff]  }
  0xb5   : > { %1215 = vmatprep.subr.bf16.mxu0 %v3462_v20  ;;  %1361 = vmatprep.subr.bf16.mxu1 %v3464_v21  ;;  %v3515_v56 = vld [vmem:[%s4346_s28 + $0x1a8] ss:$16 sps:$4 sm:$0xff]   ;;  %v3516_v57 = vld [vmem:[%s4346_s28 + $0x1c4] ss:$16 sps:$4 sm:$0xff]   ;;  %v3518_v58 = vld [vmem:[%s4346_s28 + $0x1cc] ss:$16 sps:$4 sm:$0xff]  }
  0xb6   : > { %v3520_v59 = vld [vmem:[%s4346_s28 + $0x1c0] ss:$16 sps:$4 sm:$0xff]   ;;  %v3521_v60 = vld [vmem:[%s4346_s28 + $0x1c8] ss:$16 sps:$4 sm:$0xff]   ;;  %v3522_v61 = vld [vmem:[%s4346_s28 + $0x1e4] ss:$16 sps:$4 sm:$0xff]  }
  0xb7   : > { %v3524_v62 = vld [vmem:[%s4346_s28 + $0x1ec] ss:$16 sps:$4 sm:$0xff]   ;;  %v3526_v63 = vld [vmem:[%s4346_s28 + $0x1e0] ss:$16 sps:$4 sm:$0xff]   ;;  %v3527_v0 = vld [vmem:[%s4346_s28 + $0x1e8] ss:$16 sps:$4 sm:$0xff]  }
  0xb8   : > { %1216 = vmatpush1.bf16.msra.mxu0 %v3466_v22  ;;  %1362 = vmatpush1.bf16.msra.mxu1 %v3467_v23  ;;  %v3533_v1 = vld [vmem:[%s4346_s28 + $0x204] ss:$16 sps:$4 sm:$0xff]   ;;  %v3536_v2 = vld [vmem:[%s4346_s28 + $0x20c] ss:$16 sps:$4 sm:$0xff]   ;;  %v3528_v3 = vld [vmem:[%s4339_s10] ss:$16 sps:$4 sm:$0xff]  }
  0xb9   : > { %1217 = vmatprep.subr.bf16.mxu0 %v3468_v24  ;;  %1363 = vmatprep.subr.bf16.mxu1 %v3470_v25  ;;  %v3531_v4 = vld [vmem:[%s4346_s28 + $0x200] ss:$16 sps:$4 sm:$0xff]   ;;  %v3534_v5 = vld [vmem:[%s4346_s28 + $0x208] ss:$16 sps:$4 sm:$0xff]   ;;  %v3539_v6 = vld [vmem:[%s4346_s28 + $0x224] ss:$16 sps:$4 sm:$0xff]  }
  0xba   : > { %v3542_v7 = vld [vmem:[%s4346_s28 + $0x22c] ss:$16 sps:$4 sm:$0xff]   ;;  %v3537_v8 = vld [vmem:[%s4346_s28 + $0x220] ss:$16 sps:$4 sm:$0xff]   ;;  %v3540_v9 = vld [vmem:[%s4346_s28 + $0x228] ss:$16 sps:$4 sm:$0xff]  }
  0xbb   : > { %v3545_v10 = vld [vmem:[%s4346_s28 + $0x244] ss:$16 sps:$4 sm:$0xff]   ;;  %v3548_v11 = vld [vmem:[%s4346_s28 + $0x24c] ss:$16 sps:$4 sm:$0xff]   ;;  %v3543_v12 = vld [vmem:[%s4346_s28 + $0x240] ss:$16 sps:$4 sm:$0xff]  }
  0xbc   : > { %1218 = vmatpush1.bf16.msra.mxu0 %v3472_v26  ;;  %1364 = vmatpush1.bf16.msra.mxu1 %v3473_v27  ;;  %v3546_v13 = vld [vmem:[%s4346_s28 + $0x248] ss:$16 sps:$4 sm:$0xff]   ;;  %v3591_v14 = vld [vmem:[%s4339_s10 + $0x24] ss:$16 sps:$4 sm:$0xff]   ;;  %v3593_v15 = vld [vmem:[%s4339_s10 + $0x20] ss:$16 sps:$4 sm:$0xff]  }
  0xbd   : > { %1219 = vmatprep.subr.bf16.mxu0 %v3474_v28  ;;  %1365 = vmatprep.subr.bf16.mxu1 %v3476_v29  ;;  %v3551_v16 = vld [vmem:[%s4346_s28 + $0x264] ss:$16 sps:$4 sm:$0xff]   ;;  %v3554_v17 = vld [vmem:[%s4346_s28 + $0x26c] ss:$16 sps:$4 sm:$0xff]   ;;  %v3549_v18 = vld [vmem:[%s4346_s28 + $0x260] ss:$16 sps:$4 sm:$0xff]  }
  0xbe   : > { %v3552_v19 = vld [vmem:[%s4346_s28 + $0x268] ss:$16 sps:$4 sm:$0xff]   ;;  %v3557_v20 = vld [vmem:[%s4346_s28 + $0x284] ss:$16 sps:$4 sm:$0xff]   ;;  %v3560_v21 = vld [vmem:[%s4346_s28 + $0x28c] ss:$16 sps:$4 sm:$0xff]  }
  0xbf   : > { %v3555_v22 = vld [vmem:[%s4346_s28 + $0x280] ss:$16 sps:$4 sm:$0xff]   ;;  %v3606_v23 = vld [vmem:[%s4339_s10 + $0x44] ss:$16 sps:$4 sm:$0xff]   ;;  %v3558_v24 = vld [vmem:[%s4346_s28 + $0x288] ss:$16 sps:$4 sm:$0xff]  }
  0xc0   : > { %1220 = vmatpush1.bf16.msra.mxu0 %v3478_v30  ;;  %1366 = vmatpush1.bf16.msra.mxu1 %v3479_v31  ;;  %v3608_v25 = vld [vmem:[%s4339_s10 + $0x40] ss:$16 sps:$4 sm:$0xff]   ;;  %v3563_v26 = vld [vmem:[%s4346_s28 + $0x2a4] ss:$16 sps:$4 sm:$0xff]   ;;  %v3566_v27 = vld [vmem:[%s4346_s28 + $0x2ac] ss:$16 sps:$4 sm:$0xff]  }
  0xc1   : > { %1221 = vmatprep.subr.bf16.mxu0 %v3480_v32  ;;  %1367 = vmatprep.subr.bf16.mxu1 %v3482_v33  ;;  %v3561_v28 = vld [vmem:[%s4346_s28 + $0x2a0] ss:$16 sps:$4 sm:$0xff]   ;;  %v3564_v29 = vld [vmem:[%s4346_s28 + $0x2a8] ss:$16 sps:$4 sm:$0xff]   ;;  %v3569_v30 = vld [vmem:[%s4346_s28 + $0x2c4] ss:$16 sps:$4 sm:$0xff]  }
  0xc2   : > { %v3621_v31 = vld [vmem:[%s4339_s10 + $0x64] ss:$16 sps:$4 sm:$0xff]   ;;  %v3572_v32 = vld [vmem:[%s4346_s28 + $0x2cc] ss:$16 sps:$4 sm:$0xff]   ;;  %v3567_v33 = vld [vmem:[%s4346_s28 + $0x2c0] ss:$16 sps:$4 sm:$0xff]  }
  0xc3   : > { %v3588_v48 = vld [vmem:[%s4346_s28 + $0x328] ss:$16 sps:$4 sm:$0xff]   ;;  %p5086_p2 = scmp.ne.s32.totalorder %s4144_s25, 0 }
  0xc4   : > { %1222 = vmatpush1.bf16.msra.mxu0 %v3484_v34  ;;  %1368 = vmatpush1.bf16.msra.mxu1 %v3485_v35  ;;  %v3570_v34 = vld [vmem:[%s4346_s28 + $0x2c8] ss:$16 sps:$4 sm:$0xff]   ;;  %v3623_v35 = vld [vmem:[%s4339_s10 + $0x60] ss:$16 sps:$4 sm:$0xff]  }
  0xc5   : > { %1223 = vmatprep.subr.bf16.mxu0 %v3486_v36  ;;  %1369 = vmatprep.subr.bf16.mxu1 %v3488_v37  ;;  %v3575_v36 = vld [vmem:[%s4346_s28 + $0x2e4] ss:$16 sps:$4 sm:$0xff]   ;;  %v3578_v37 = vld [vmem:[%s4346_s28 + $0x2ec] ss:$16 sps:$4 sm:$0xff]  }
  0xc8   : > { %1224 = vmatpush1.bf16.msra.mxu0 %v3490_v38  ;;  %1370 = vmatpush1.bf16.msra.mxu1 %v3491_v39  ;;  %v3573_v38 = vld [vmem:[%s4346_s28 + $0x2e0] ss:$16 sps:$4 sm:$0xff]   ;;  %v3576_v39 = vld [vmem:[%s4346_s28 + $0x2e8] ss:$16 sps:$4 sm:$0xff]  }
  0xc9   : > { %1225 = vmatprep.subr.bf16.mxu0 %v3492_v40  ;;  %1371 = vmatprep.subr.bf16.mxu1 %v3494_v41  ;;  %v3638_v40 = vld [vmem:[%s4339_s10 + $0xc] ss:$16 sps:$4 sm:$0xff]   ;;  %v3581_v41 = vld [vmem:[%s4346_s28 + $0x304] ss:$16 sps:$4 sm:$0xff]  }
  0xcc   : > { %1226 = vmatpush1.bf16.msra.mxu0 %v3496_v42  ;;  %1372 = vmatpush1.bf16.msra.mxu1 %v3497_v43  ;;  %v3584_v42 = vld [vmem:[%s4346_s28 + $0x30c] ss:$16 sps:$4 sm:$0xff]   ;;  %v3579_v43 = vld [vmem:[%s4346_s28 + $0x300] ss:$16 sps:$4 sm:$0xff]  }
  0xcd   : > { %1227 = vmatprep.subr.bf16.mxu0 %v3498_v44  ;;  %1373 = vmatprep.subr.bf16.mxu1 %v3500_v45  ;;  %v3582_v44 = vld [vmem:[%s4346_s28 + $0x308] ss:$16 sps:$4 sm:$0xff]   ;;  %v3587_v45 = vld [vmem:[%s4346_s28 + $0x324] ss:$16 sps:$4 sm:$0xff]  }
  0xd0   : > { %1228 = vmatpush1.bf16.msra.mxu0 %v3502_v46  ;;  %1374 = vmatpush1.bf16.msra.mxu1 %v3503_v47  ;;  %v3590_v46 = vld [vmem:[%s4346_s28 + $0x32c] ss:$16 sps:$4 sm:$0xff]   ;;  %v3585_v47 = vld [vmem:[%s4346_s28 + $0x320] ss:$16 sps:$4 sm:$0xff]  }
  0xd1   : > { %1229 = vmatprep.subr.bf16.mxu0 %v3504_v49  ;;  %1375 = vmatprep.subr.bf16.mxu1 %v3506_v50  ;;  %v3596_v49 = vld [vmem:[%s4346_s28 + $0x344] ss:$16 sps:$4 sm:$0xff]   ;;  %v3599_v50 = vld [vmem:[%s4346_s28 + $0x34c] ss:$16 sps:$4 sm:$0xff]  }
  0xd4   : > { %1230 = vmatpush1.bf16.msra.mxu0 %v3508_v51  ;;  %1376 = vmatpush1.bf16.msra.mxu1 %v3509_v52  ;;  %v3594_v51 = vld [vmem:[%s4346_s28 + $0x340] ss:$16 sps:$4 sm:$0xff]   ;;  %v3597_v52 = vld [vmem:[%s4346_s28 + $0x348] ss:$16 sps:$4 sm:$0xff]  }
  0xd5   : > { %1231 = vmatprep.subr.bf16.mxu0 %v3510_v53  ;;  %1377 = vmatprep.subr.bf16.mxu1 %v3512_v54  ;;  %v3602_v53 = vld [vmem:[%s4346_s28 + $0x364] ss:$16 sps:$4 sm:$0xff]   ;;  %v3605_v54 = vld [vmem:[%s4346_s28 + $0x36c] ss:$16 sps:$4 sm:$0xff]  }
  0xd8   : > { %1232 = vmatpush1.bf16.msra.mxu0 %v3514_v55  ;;  %1378 = vmatpush1.bf16.msra.mxu1 %v3515_v56  ;;  %v3600_v55 = vld [vmem:[%s4346_s28 + $0x360] ss:$16 sps:$4 sm:$0xff]   ;;  %v3603_v56 = vld [vmem:[%s4346_s28 + $0x368] ss:$16 sps:$4 sm:$0xff]  }
  0xd9   : > { %1233 = vmatprep.subr.bf16.mxu0 %v3516_v57  ;;  %1379 = vmatprep.subr.bf16.mxu1 %v3518_v58  ;;  %v3611_v57 = vld [vmem:[%s4346_s28 + $0x384] ss:$16 sps:$4 sm:$0xff]   ;;  %v3614_v58 = vld [vmem:[%s4346_s28 + $0x38c] ss:$16 sps:$4 sm:$0xff]  }
  0xdc   : > { %1234 = vmatpush1.bf16.msra.mxu0 %v3520_v59  ;;  %1380 = vmatpush1.bf16.msra.mxu1 %v3521_v60  ;;  %v3609_v59 = vld [vmem:[%s4346_s28 + $0x380] ss:$16 sps:$4 sm:$0xff]   ;;  %v3612_v60 = vld [vmem:[%s4346_s28 + $0x388] ss:$16 sps:$4 sm:$0xff]  }
  0xdd   : > { %1235 = vmatprep.subr.bf16.mxu0 %v3522_v61  ;;  %1381 = vmatprep.subr.bf16.mxu1 %v3524_v62  ;;  %v3617_v61 = vld [vmem:[%s4346_s28 + $0x3a4] ss:$16 sps:$4 sm:$0xff]   ;;  %v3620_v62 = vld [vmem:[%s4346_s28 + $0x3ac] ss:$16 sps:$4 sm:$0xff]  }
  0xe0   : > { %1236 = vmatpush1.bf16.msra.mxu0 %v3526_v63  ;;  %1382 = vmatpush1.bf16.msra.mxu1 %v3527_v0  ;;  %v3615_v63 = vld [vmem:[%s4346_s28 + $0x3a0] ss:$16 sps:$4 sm:$0xff]   ;;  %v3618_v0 = vld [vmem:[%s4346_s28 + $0x3a8] ss:$16 sps:$4 sm:$0xff]  }
  0xe1   : > { %1278 = vmatprep.subr.bf16.mxu0 %v3533_v1  ;;  %1424 = vmatprep.subr.bf16.mxu1 %v3536_v2  ;;  %v3626_v1 = vld [vmem:[%s4346_s28 + $0x3c4] ss:$16 sps:$4 sm:$0xff]   ;;  %v3629_v2 = vld [vmem:[%s4346_s28 + $0x3cc] ss:$16 sps:$4 sm:$0xff]  }
  0xe3   : > { %1238 = vmatmul.mubr.bf16.vlgmr.msra.gmra.mrb[0].mxu0 %v3528_v3  ;;  %1384 = vmatmul.mubr.bf16.vlgmr.msra.gmra.mrb[0].mxu1 %v3528_v3  ;;  %v3624_v3 = vld [vmem:[%s4346_s28 + $0x3c0] ss:$16 sps:$4 sm:$0xff]  }
  0xe4   : > { %1279 = vmatpush1.bf16.msra.mxu0 %v3531_v4  ;;  %1425 = vmatpush1.bf16.msra.mxu1 %v3534_v5  ;;  %v3627_v4 = vld [vmem:[%s4346_s28 + $0x3c8] ss:$16 sps:$4 sm:$0xff]   ;;  %v3632_v5 = vld [vmem:[%s4346_s28 + $0x3e4] ss:$16 sps:$4 sm:$0xff]  }
  0xe5   : > { %1280 = vmatprep.subr.bf16.mxu0 %v3539_v6  ;;  %1426 = vmatprep.subr.bf16.mxu1 %v3542_v7  ;;  %v3635_v6 = vld [vmem:[%s4346_s28 + $0x3ec] ss:$16 sps:$4 sm:$0xff]   ;;  %v3630_v7 = vld [vmem:[%s4346_s28 + $0x3e0] ss:$16 sps:$4 sm:$0xff]  }
  0xe6   : > { %1247 = vmatprep.mubr.bf16.mxu0 %v3591_v14  ;;  %1393 = vmatprep.mubr.bf16.mxu1 %v3591_v14  ;;  %v3645_v14 = vld [vmem:[%s4339_s10 + $0x6c] ss:$16 sps:$4 sm:$0xff]  }
  0xe8   : > { %1281 = vmatpush1.bf16.msra.mxu0 %v3537_v8  ;;  %1427 = vmatpush1.bf16.msra.mxu1 %v3540_v9  ;;  %v3633_v8 = vld [vmem:[%s4346_s28 + $0x3e8] ss:$16 sps:$4 sm:$0xff]  }
  0xe9   : > { %1282 = vmatprep.subr.bf16.mxu0 %v3545_v10  ;;  %1428 = vmatprep.subr.bf16.mxu1 %v3548_v11  ;;  %v3636_v9 = vld [vmem:[%s4339_s10 + $0x8] ss:$16 sps:$4 sm:$0xff]   ;;  %v3639_v10 = vld [vmem:[%s4339_s10 + $0x2c] ss:$16 sps:$4 sm:$0xff]  }
  0xea   : > { %v3641_v11 = vld [vmem:[%s4339_s10 + $0x28] ss:$16 sps:$4 sm:$0xff]  }
  0xeb   : > { %1248 = vmatmul.mubr.bf16.gmra.mrb[4].mxu0 %v3593_v15  ;;  %1394 = vmatmul.mubr.bf16.gmra.mrb[4].mxu1 %v3593_v15  ;;  %v3647_v15 = vld [vmem:[%s4339_s10 + $0x68] ss:$16 sps:$4 sm:$0xff]  }
  0xec   : > { %1283 = vmatpush1.bf16.msra.mxu0 %v3543_v12  ;;  %1429 = vmatpush1.bf16.msra.mxu1 %v3546_v13  ;;  %v3642_v12 = vld [vmem:[%s4339_s10 + $0x4c] ss:$16 sps:$4 sm:$0xff]   ;;  %v3644_v13 = vld [vmem:[%s4339_s10 + $0x48] ss:$16 sps:$4 sm:$0xff]  }
  0xed   : > { %1284 = vmatprep.subr.bf16.mxu0 %v3551_v16  ;;  %1430 = vmatprep.subr.bf16.mxu1 %v3554_v17 }
  0xee   : > { %1257 = vmatprep.mubr.bf16.mxu0 %v3606_v23  ;;  %1403 = vmatprep.mubr.bf16.mxu1 %v3606_v23 }
  0xf0   : > { %1285 = vmatpush1.bf16.msra.mxu0 %v3549_v18  ;;  %1431 = vmatpush1.bf16.msra.mxu1 %v3552_v19 }
  0xf1   : > { %1286 = vmatprep.subr.bf16.mxu0 %v3557_v20  ;;  %1432 = vmatprep.subr.bf16.mxu1 %v3560_v21 }
  0xf3   : > { %1258 = vmatmul.mubr.bf16.gmra.mrb[8].mxu0 %v3608_v25  ;;  %1404 = vmatmul.mubr.bf16.gmra.mrb[8].mxu1 %v3608_v25 }
  0xf4   : > { %1287 = vmatpush1.bf16.msra.mxu0 %v3555_v22  ;;  %1433 = vmatpush1.bf16.msra.mxu1 %v3558_v24 }
  0xf5   : > { %1288 = vmatprep.subr.bf16.mxu0 %v3563_v26  ;;  %1434 = vmatprep.subr.bf16.mxu1 %v3566_v27 }
  0xf6   : > { %1267 = vmatprep.mubr.bf16.mxu0 %v3621_v31  ;;  %1413 = vmatprep.mubr.bf16.mxu1 %v3621_v31 }
  0xf8   : > { %1289 = vmatpush1.bf16.msra.mxu0 %v3561_v28  ;;  %1435 = vmatpush1.bf16.msra.mxu1 %v3564_v29 }
  0xf9   : > { %1290 = vmatprep.subr.bf16.mxu0 %v3569_v30  ;;  %1436 = vmatprep.subr.bf16.mxu1 %v3572_v32 }
  0xfb   : > { %1268 = vmatmul.mubr.bf16.gmra.mrb[12].mxu0 %v3623_v35  ;;  %1414 = vmatmul.mubr.bf16.gmra.mrb[12].mxu1 %v3623_v35 }
  0xfc   : > { %1291 = vmatpush1.bf16.msra.mxu0 %v3567_v33  ;;  %1437 = vmatpush1.bf16.msra.mxu1 %v3570_v34 }
  0xfd   : > { %1292 = vmatprep.subr.bf16.mxu0 %v3575_v36  ;;  %1438 = vmatprep.subr.bf16.mxu1 %v3578_v37 }
  0xfe   : > { %1310 = vmatprep.mubr.bf16.mxu0 %v3638_v40  ;;  %1456 = vmatprep.mubr.bf16.mxu1 %v3638_v40 }
 0x100   : > { %1293 = vmatpush1.bf16.msra.mxu0 %v3573_v38  ;;  %1439 = vmatpush1.bf16.msra.mxu1 %v3576_v39 }
 0x101   : > { %1294 = vmatprep.subr.bf16.mxu0 %v3581_v41  ;;  %1440 = vmatprep.subr.bf16.mxu1 %v3584_v42 }
 0x104   : > { %1295 = vmatpush1.bf16.msra.mxu0 %v3579_v43  ;;  %1441 = vmatpush1.bf16.msra.mxu1 %v3582_v44 }
 0x105   : > { %1296 = vmatprep.subr.bf16.mxu0 %v3587_v45  ;;  %1442 = vmatprep.subr.bf16.mxu1 %v3590_v46 }
 0x108   : > { %1297 = vmatpush1.bf16.msra.mxu0 %v3585_v47  ;;  %1443 = vmatpush1.bf16.msra.mxu1 %v3588_v48  ;;  %v1503_v48 = vlaneseq (!%p5086_p2) }
 0x109   : > { %1298 = vmatprep.subr.bf16.mxu0 %v3596_v49  ;;  %1444 = vmatprep.subr.bf16.mxu1 %v3599_v50  ;;  %v1501_v50 = vld [vmem:[#allocation9] sm:$0xf] (!%p5086_p2) }
 0x10a   : > { %v1504_v49 = vshrl.u32 (!%p5086_p2), %v1503_v48, 7 }
 0x10c   : > { %1299 = vmatpush1.bf16.msra.mxu0 %v3594_v51  ;;  %1445 = vmatpush1.bf16.msra.mxu1 %v3597_v52  ;;  %v1505_v51 = vsub.s32 (!%p5086_p2), 0, %v1504_v49  ;;  %v1509_v52 = vsub.s32 (!%p5086_p2), 1, %v1504_v49 }
 0x10d   : > { %1300 = vmatprep.subr.bf16.mxu0 %v3602_v53  ;;  %1446 = vmatprep.subr.bf16.mxu1 %v3605_v54  ;;  %v1513_v53 = vsub.s32 (!%p5086_p2), 2, %v1504_v49  ;;  %v1517_v54 = vsub.s32 (!%p5086_p2), 3, %v1504_v49 }
 0x110   : > { %1301 = vmatpush1.bf16.msra.mxu0 %v3600_v55  ;;  %1447 = vmatpush1.bf16.msra.mxu1 %v3603_v56  ;;  %v1506_v55 = vrot.slane (!%p5086_p2), %v1501_v50, %v1505_v51  ;;  %v1510_v56 = vrot.slane (!%p5086_p2), %v1501_v50, %v1509_v52 }
 0x111   : > { %1302 = vmatprep.subr.bf16.mxu0 %v3611_v57  ;;  %1448 = vmatprep.subr.bf16.mxu1 %v3614_v58  ;;  %v1514_v57 = vrot.slane (!%p5086_p2), %v1501_v50, %v1513_v53  ;;  %v1518_v58 = vrot.slane (!%p5086_p2), %v1501_v50, %v1517_v54 }
 0x114   : > { %1303 = vmatpush1.bf16.msra.mxu0 %v3609_v59  ;;  %1449 = vmatpush1.bf16.msra.mxu1 %v3612_v60 }
 0x115   : > { %1304 = vmatprep.subr.bf16.mxu0 %v3617_v61  ;;  %1450 = vmatprep.subr.bf16.mxu1 %v3620_v62 }
 0x118   : > { %1305 = vmatpush1.bf16.msra.mxu0 %v3615_v63  ;;  %1451 = vmatpush1.bf16.msra.mxu1 %v3618_v0 }
 0x119   : > { %1306 = vmatprep.subr.bf16.mxu0 %v3626_v1  ;;  %1452 = vmatprep.subr.bf16.mxu1 %v3629_v2 }
 0x11c   : > { %1307 = vmatpush1.bf16.msra.mxu0 %v3624_v3  ;;  %1453 = vmatpush1.bf16.msra.mxu1 %v3627_v4 }
 0x11d   : > { %1308 = vmatprep.subr.bf16.mxu0 %v3632_v5  ;;  %1454 = vmatprep.subr.bf16.mxu1 %v3635_v6 }
 0x120   : > { %1309 = vmatpush1.bf16.msra.mxu0 %v3630_v7  ;;  %1455 = vmatpush1.bf16.msra.mxu1 %v3633_v8 }
 0x123   : > { %1311 = vmatmul.mubr.bf16.vlgmr.msra.gmra.mrb[0].mxu0 %v3636_v9  ;;  %1457 = vmatmul.mubr.bf16.vlgmr.msra.gmra.mrb[0].mxu1 %v3636_v9 }
 0x124   : > { %1320 = vmatprep.mubr.bf16.mxu0 %v3639_v10  ;;  %1466 = vmatprep.mubr.bf16.mxu1 %v3639_v10 }
 0x12b   : > { %1321 = vmatmul.mubr.bf16.gmra.mrb[4].mxu0 %v3641_v11  ;;  %1467 = vmatmul.mubr.bf16.gmra.mrb[4].mxu1 %v3641_v11 }
 0x12c   : > { %1330 = vmatprep.mubr.bf16.mxu0 %v3642_v12  ;;  %1476 = vmatprep.mubr.bf16.mxu1 %v3642_v12 }
 0x133   : > { %1331 = vmatmul.mubr.bf16.gmra.mrb[8].mxu0 %v3644_v13  ;;  %1477 = vmatmul.mubr.bf16.gmra.mrb[8].mxu1 %v3644_v13 }
 0x134   : > { %1340 = vmatprep.mubr.bf16.mxu0 %v3645_v14  ;;  %1486 = vmatprep.mubr.bf16.mxu1 %v3645_v14 }
 0x13b   : > { %1341 = vmatmul.mubr.bf16.gmra.mrb[12].mxu0 %v3647_v15  ;;  %1487 = vmatmul.mubr.bf16.gmra.mrb[12].mxu1 %v3647_v15 }
 0x1f6   : > { %v4504_v16 = vpop.f32.mrb[0].mxu0  ;;  %v4506_v17 = vpop.f32.mrb[0].mxu1 }
 0x1f7   : > { %v4508_v18 = vpop.f32.mrb[1].mxu0  ;;  %v4510_v19 = vpop.f32.mrb[1].mxu1  ;;  %v1523_v59 = vadd.f32 (!%p5086_p2), %v1506_v55, %v4504_v16  ;;  %v1525_v61 = vadd.f32 (!%p5086_p2), %v1514_v57, %v4506_v17 }
 0x1f8   : > { %v4512_v20 = vpop.f32.mrb[2].mxu0  ;;  %v4514_v21 = vpop.f32.mrb[2].mxu1  ;;  %v1524_v60 = vadd.f32 (!%p5086_p2), %v1510_v56, %v4508_v18  ;;  %v1526_v62 = vadd.f32 (!%p5086_p2), %v1518_v58, %v4510_v19 }
 0x1f9   : > { %v4516_v22 = vpop.f32.mrb[3].mxu0  ;;  %v4518_v23 = vpop.f32.mrb[3].mxu1  ;;  %v1527_v63 = vadd.f32 (!%p5086_p2), %v1506_v55, %v4512_v20  ;;  %v1529_v1 = vadd.f32 (!%p5086_p2), %v1514_v57, %v4514_v21  ;;  %1555 = vst [vmem:[#allocation2] sm:$0xff] (!%p5086_p2), %v1523_v59  ;;  %1557 = vst [vmem:[#allocation2 + $0x10] sm:$0xff] (!%p5086_p2), %v1525_v61 }
 0x1fa   : > { %v1528_v0 = vadd.f32 (!%p5086_p2), %v1510_v56, %v4516_v22  ;;  %v1530_v2 = vadd.f32 (!%p5086_p2), %v1518_v58, %v4518_v23  ;;  %1556 = vst [vmem:[#allocation2 + $0x8] sm:$0xff] (!%p5086_p2), %v1524_v60  ;;  %1558 = vst [vmem:[#allocation2 + $0x18] sm:$0xff] (!%p5086_p2), %v1526_v62 }
 0x1fb   : > { %1559 = vst [vmem:[#allocation2 + $0x20] sm:$0xff] (!%p5086_p2), %v1527_v63  ;;  %1561 = vst [vmem:[#allocation2 + $0x30] sm:$0xff] (!%p5086_p2), %v1529_v1 }
 0x1fc   : > { %1560 = vst [vmem:[#allocation2 + $0x28] sm:$0xff] (!%p5086_p2), %v1528_v0  ;;  %1562 = vst [vmem:[#allocation2 + $0x38] sm:$0xff] (!%p5086_p2), %v1530_v2 }
 0x1fe   : > { %v4520_v24 = vpop.f32.mrb[4].mxu0  ;;  %v4522_v25 = vpop.f32.mrb[4].mxu1 }
 0x1ff   : > { %v4524_v26 = vpop.f32.mrb[5].mxu0  ;;  %v4526_v27 = vpop.f32.mrb[5].mxu1  ;;  %v1531_v3 = vadd.f32 (!%p5086_p2), %v1506_v55, %v4520_v24  ;;  %v1533_v5 = vadd.f32 (!%p5086_p2), %v1514_v57, %v4522_v25 }
 0x200   : > { %v4528_v28 = vpop.f32.mrb[6].mxu0  ;;  %v4530_v29 = vpop.f32.mrb[6].mxu1  ;;  %v1532_v4 = vadd.f32 (!%p5086_p2), %v1510_v56, %v4524_v26  ;;  %v1534_v6 = vadd.f32 (!%p5086_p2), %v1518_v58, %v4526_v27 }
 0x201   : > { %v4532_v30 = vpop.f32.mrb[7].mxu0  ;;  %v4534_v31 = vpop.f32.mrb[7].mxu1  ;;  %v1535_v7 = vadd.f32 (!%p5086_p2), %v1506_v55, %v4528_v28  ;;  %v1537_v9 = vadd.f32 (!%p5086_p2), %v1514_v57, %v4530_v29  ;;  %1563 = vst [vmem:[#allocation2 + $0x40] sm:$0xff] (!%p5086_p2), %v1531_v3  ;;  %1565 = vst [vmem:[#allocation2 + $0x50] sm:$0xff] (!%p5086_p2), %v1533_v5 }
 0x202   : > { %v1536_v8 = vadd.f32 (!%p5086_p2), %v1510_v56, %v4532_v30  ;;  %v1538_v10 = vadd.f32 (!%p5086_p2), %v1518_v58, %v4534_v31  ;;  %1564 = vst [vmem:[#allocation2 + $0x48] sm:$0xff] (!%p5086_p2), %v1532_v4  ;;  %1566 = vst [vmem:[#allocation2 + $0x58] sm:$0xff] (!%p5086_p2), %v1534_v6 }
 0x203   : > { %1567 = vst [vmem:[#allocation2 + $0x60] sm:$0xff] (!%p5086_p2), %v1535_v7  ;;  %1569 = vst [vmem:[#allocation2 + $0x70] sm:$0xff] (!%p5086_p2), %v1537_v9 }
 0x204   : > { %1568 = vst [vmem:[#allocation2 + $0x68] sm:$0xff] (!%p5086_p2), %v1536_v8  ;;  %1570 = vst [vmem:[#allocation2 + $0x78] sm:$0xff] (!%p5086_p2), %v1538_v10 }
 0x206   : > { %v4536_v32 = vpop.f32.mrb[8].mxu0  ;;  %v4538_v33 = vpop.f32.mrb[8].mxu1 }
 0x207   : > { %v4540_v34 = vpop.f32.mrb[9].mxu0  ;;  %v4542_v35 = vpop.f32.mrb[9].mxu1  ;;  %v1539_v11 = vadd.f32 (!%p5086_p2), %v1506_v55, %v4536_v32  ;;  %v1541_v13 = vadd.f32 (!%p5086_p2), %v1514_v57, %v4538_v33 }
 0x208   : > { %v4544_v36 = vpop.f32.mrb[10].mxu0  ;;  %v4546_v37 = vpop.f32.mrb[10].mxu1  ;;  %v1540_v12 = vadd.f32 (!%p5086_p2), %v1510_v56, %v4540_v34  ;;  %v1542_v14 = vadd.f32 (!%p5086_p2), %v1518_v58, %v4542_v35 }
 0x209   : > { %v4548_v38 = vpop.f32.mrb[11].mxu0  ;;  %v4550_v39 = vpop.f32.mrb[11].mxu1  ;;  %v1543_v15 = vadd.f32 (!%p5086_p2), %v1506_v55, %v4544_v36  ;;  %v1545_v49 = vadd.f32 (!%p5086_p2), %v1514_v57, %v4546_v37  ;;  %1571 = vst [vmem:[#allocation2 + $0x80] sm:$0xff] (!%p5086_p2), %v1539_v11  ;;  %1573 = vst [vmem:[#allocation2 + $0x90] sm:$0xff] (!%p5086_p2), %v1541_v13 }
 0x20a   : > { %v1544_v48 = vadd.f32 (!%p5086_p2), %v1510_v56, %v4548_v38  ;;  %v1546_v50 = vadd.f32 (!%p5086_p2), %v1518_v58, %v4550_v39  ;;  %1572 = vst [vmem:[#allocation2 + $0x88] sm:$0xff] (!%p5086_p2), %v1540_v12  ;;  %1574 = vst [vmem:[#allocation2 + $0x98] sm:$0xff] (!%p5086_p2), %v1542_v14 }
 0x20b   : > { %1500 = sbr.rel (%p5086_p2) target bundleno = 533 (0x215), region = 68  ;;  %1575 = vst [vmem:[#allocation2 + $0xa0] sm:$0xff] (!%p5086_p2), %v1543_v15  ;;  %1577 = vst [vmem:[#allocation2 + $0xb0] sm:$0xff] (!%p5086_p2), %v1545_v49 }
 0x20c   : > { %1576 = vst [vmem:[#allocation2 + $0xa8] sm:$0xff] (!%p5086_p2), %v1544_v48  ;;  %1578 = vst [vmem:[#allocation2 + $0xb8] sm:$0xff] (!%p5086_p2), %v1546_v50 }
 0x20e   : > { %v4552_v40 = vpop.f32.mrb[12].mxu0  ;;  %v4554_v41 = vpop.f32.mrb[12].mxu1 }
 0x20f   : > { %v4556_v42 = vpop.f32.mrb[13].mxu0  ;;  %v4558_v43 = vpop.f32.mrb[13].mxu1  ;;  %v1547_v51 = vadd.f32 (!%p5086_p2), %v1506_v55, %v4552_v40  ;;  %v1549_v53 = vadd.f32 (!%p5086_p2), %v1514_v57, %v4554_v41 }
 0x210   : > { %v4560_v44 = vpop.f32.mrb[14].mxu0  ;;  %v4562_v45 = vpop.f32.mrb[14].mxu1  ;;  %v1548_v52 = vadd.f32 (!%p5086_p2), %v1510_v56, %v4556_v42  ;;  %v1550_v54 = vadd.f32 (!%p5086_p2), %v1518_v58, %v4558_v43 }
 0x211   : > { %v4564_v46 = vpop.f32.mrb[15].mxu0  ;;  %v4566_v47 = vpop.f32.mrb[15].mxu1  ;;  %v1551_v59 = vadd.f32 (!%p5086_p2), %v1506_v55, %v4560_v44  ;;  %v1553_v61 = vadd.f32 (!%p5086_p2), %v1514_v57, %v4562_v45  ;;  %1579 = vst [vmem:[#allocation2 + $0xc0] sm:$0xff] (!%p5086_p2), %v1547_v51  ;;  %1581 = vst [vmem:[#allocation2 + $0xd0] sm:$0xff] (!%p5086_p2), %v1549_v53 }
 0x212   : > { %v1552_v60 = vadd.f32 %v1510_v56, %v4564_v46  ;;  %v1554_v62 = vadd.f32 %v1518_v58, %v4566_v47  ;;  %1580 = vst [vmem:[#allocation2 + $0xc8] sm:$0xff] %v1548_v52  ;;  %1582 = vst [vmem:[#allocation2 + $0xd8] sm:$0xff] %v1550_v54 }
 0x213   : > { %1583 = vst [vmem:[#allocation2 + $0xe0] sm:$0xff] %v1551_v59  ;;  %1585 = vst [vmem:[#allocation2 + $0xf0] sm:$0xff] %v1553_v61 }
 0x214   : > { %1584 = vst [vmem:[#allocation2 + $0xe8] sm:$0xff] %v1552_v60  ;;  %1586 = vst [vmem:[#allocation2 + $0xf8] sm:$0xff] %v1554_v62 }
 0x215 PF: > { %p5087_p8 = scmp.eq.s32.totalorder %s4144_s25, 0 }
 0x216   : > { %v1591_v63 = vld [vmem:[#allocation2] sm:$0xff] (!%p5087_p8)  ;;  %v1592_v55 = vld [vmem:[#allocation2 + $0x8] sm:$0xff] (!%p5087_p8)  ;;  %v1593_v0 = vld [vmem:[#allocation2 + $0x10] sm:$0xff] (!%p5087_p8) }
 0x217   : > { %1590 = sbr.rel (%p5087_p8) target bundleno = 553 (0x229), region = 72  ;;  %v1623_v56 = vadd.f32 (!%p5087_p8), %v1591_v63, %v4504_v16  ;;  %v1624_v57 = vadd.f32 (!%p5087_p8), %v1592_v55, %v4508_v18  ;;  %v1625_v58 = vadd.f32 (!%p5087_p8), %v1593_v0, %v4506_v17  ;;  %v1594_v1 = vld [vmem:[#allocation2 + $0x18] sm:$0xff] (!%p5087_p8)  ;;  %v1595_v2 = vld [vmem:[#allocation2 + $0x20] sm:$0xff] (!%p5087_p8)  ;;  %v1596_v3 = vld [vmem:[#allocation2 + $0x28] sm:$0xff] (!%p5087_p8) }
 0x218   : > { %v1626_v4 = vadd.f32 (!%p5087_p8), %v1594_v1, %v4510_v19  ;;  %v1627_v5 = vadd.f32 (!%p5087_p8), %v1595_v2, %v4512_v20  ;;  %v1628_v6 = vadd.f32 (!%p5087_p8), %v1596_v3, %v4516_v22  ;;  %v1597_v7 = vld [vmem:[#allocation2 + $0x30] sm:$0xff] (!%p5087_p8)  ;;  %v1598_v8 = vld [vmem:[#allocation2 + $0x38] sm:$0xff] (!%p5087_p8)  ;;  %v1599_v9 = vld [vmem:[#allocation2 + $0x40] sm:$0xff] (!%p5087_p8) }
 0x219   : > { %1655 = vst [vmem:[#allocation2] sm:$0xff] (!%p5087_p8), %v1623_v56  ;;  %1656 = vst [vmem:[#allocation2 + $0x8] sm:$0xff] (!%p5087_p8), %v1624_v57  ;;  %v1629_v16 = vadd.f32 (!%p5087_p8), %v1597_v7, %v4514_v21  ;;  %v1630_v18 = vadd.f32 (!%p5087_p8), %v1598_v8, %v4518_v23  ;;  %v1631_v17 = vadd.f32 (!%p5087_p8), %v1599_v9, %v4520_v24  ;;  %v1600_v10 = vld [vmem:[#allocation2 + $0x48] sm:$0xff] (!%p5087_p8)  ;;  %v1601_v11 = vld [vmem:[#allocation2 + $0x50] sm:$0xff] (!%p5087_p8) }
 0x21a   : > { %1657 = vst [vmem:[#allocation2 + $0x10] sm:$0xff] (!%p5087_p8), %v1625_v58  ;;  %v1602_v12 = vld [vmem:[#allocation2 + $0x58] sm:$0xff] (!%p5087_p8)  ;;  %1658 = vst [vmem:[#allocation2 + $0x18] sm:$0xff] (!%p5087_p8), %v1626_v4  ;;  %v1632_v19 = vadd.f32 (!%p5087_p8), %v1600_v10, %v4524_v26  ;;  %v1633_v20 = vadd.f32 (!%p5087_p8), %v1601_v11, %v4522_v25  ;;  %v1603_v13 = vld [vmem:[#allocation2 + $0x60] sm:$0xff] (!%p5087_p8) }
 0x21b   : > { %1659 = vst [vmem:[#allocation2 + $0x20] sm:$0xff] (!%p5087_p8), %v1627_v5  ;;  %1660 = vst [vmem:[#allocation2 + $0x28] sm:$0xff] (!%p5087_p8), %v1628_v6  ;;  %v1634_v22 = vadd.f32 (!%p5087_p8), %v1602_v12, %v4526_v27  ;;  %v1604_v14 = vld [vmem:[#allocation2 + $0x68] sm:$0xff] (!%p5087_p8)  ;;  %v1605_v15 = vld [vmem:[#allocation2 + $0x70] sm:$0xff] (!%p5087_p8)  ;;  %v1635_v21 = vadd.f32 (!%p5087_p8), %v1603_v13, %v4528_v28 }
 0x21c   : > { %1661 = vst [vmem:[#allocation2 + $0x30] sm:$0xff] (!%p5087_p8), %v1629_v16  ;;  %1662 = vst [vmem:[#allocation2 + $0x38] sm:$0xff] (!%p5087_p8), %v1630_v18  ;;  %v1636_v23 = vadd.f32 (!%p5087_p8), %v1604_v14, %v4532_v30  ;;  %v1637_v24 = vadd.f32 (!%p5087_p8), %v1605_v15, %v4530_v29  ;;  %v1606_v48 = vld [vmem:[#allocation2 + $0x78] sm:$0xff] (!%p5087_p8)  ;;  %v1607_v49 = vld [vmem:[#allocation2 + $0x80] sm:$0xff] (!%p5087_p8) }
 0x21d   : > { %1663 = vst [vmem:[#allocation2 + $0x40] sm:$0xff] (!%p5087_p8), %v1631_v17  ;;  %v1608_v50 = vld [vmem:[#allocation2 + $0x88] sm:$0xff] (!%p5087_p8)  ;;  %1664 = vst [vmem:[#allocation2 + $0x48] sm:$0xff] (!%p5087_p8), %v1632_v19  ;;  %v1638_v25 = vadd.f32 (!%p5087_p8), %v1606_v48, %v4534_v31  ;;  %v1639_v26 = vadd.f32 (!%p5087_p8), %v1607_v49, %v4536_v32  ;;  %v1609_v51 = vld [vmem:[#allocation2 + $0x90] sm:$0xff] (!%p5087_p8) }
 0x21e   : > { %1665 = vst [vmem:[#allocation2 + $0x50] sm:$0xff] %v1633_v20  ;;  %1666 = vst [vmem:[#allocation2 + $0x58] sm:$0xff] %v1634_v22  ;;  %v1640_v27 = vadd.f32 %v1608_v50, %v4540_v34  ;;  %v1610_v52 = vld [vmem:[#allocation2 + $0x98] sm:$0xff]  ;;  %v1611_v53 = vld [vmem:[#allocation2 + $0xa0] sm:$0xff]  ;;  %v1641_v28 = vadd.f32 %v1609_v51, %v4538_v33 }
 0x21f   : > { %1667 = vst [vmem:[#allocation2 + $0x60] sm:$0xff] %v1635_v21  ;;  %1668 = vst [vmem:[#allocation2 + $0x68] sm:$0xff] %v1636_v23  ;;  %v1642_v29 = vadd.f32 %v1610_v52, %v4542_v35  ;;  %v1643_v30 = vadd.f32 %v1611_v53, %v4544_v36  ;;  %v1612_v54 = vld [vmem:[#allocation2 + $0xa8] sm:$0xff]  ;;  %v1613_v59 = vld [vmem:[#allocation2 + $0xb0] sm:$0xff] }
 0x220   : > { %1669 = vst [vmem:[#allocation2 + $0x70] sm:$0xff] %v1637_v24  ;;  %v1614_v60 = vld [vmem:[#allocation2 + $0xb8] sm:$0xff]  ;;  %1670 = vst [vmem:[#allocation2 + $0x78] sm:$0xff] %v1638_v25  ;;  %v1644_v31 = vadd.f32 %v1612_v54, %v4548_v38  ;;  %v1645_v32 = vadd.f32 %v1613_v59, %v4546_v37  ;;  %v1615_v61 = vld [vmem:[#allocation2 + $0xc0] sm:$0xff] }
 0x221   : > { %1671 = vst [vmem:[#allocation2 + $0x80] sm:$0xff] %v1639_v26  ;;  %1672 = vst [vmem:[#allocation2 + $0x88] sm:$0xff] %v1640_v27  ;;  %v1646_v34 = vadd.f32 %v1614_v60, %v4550_v39  ;;  %v1616_v62 = vld [vmem:[#allocation2 + $0xc8] sm:$0xff]  ;;  %v1617_v63 = vld [vmem:[#allocation2 + $0xd0] sm:$0xff]  ;;  %v1647_v33 = vadd.f32 %v1615_v61, %v4552_v40 }
 0x222   : > { %1673 = vst [vmem:[#allocation2 + $0x90] sm:$0xff] %v1641_v28  ;;  %1674 = vst [vmem:[#allocation2 + $0x98] sm:$0xff] %v1642_v29  ;;  %v1648_v35 = vadd.f32 %v1616_v62, %v4556_v42  ;;  %v1649_v36 = vadd.f32 %v1617_v63, %v4554_v41  ;;  %v1618_v55 = vld [vmem:[#allocation2 + $0xd8] sm:$0xff]  ;;  %v1619_v0 = vld [vmem:[#allocation2 + $0xe0] sm:$0xff] }
 0x223   : > { %1675 = vst [vmem:[#allocation2 + $0xa0] sm:$0xff] %v1643_v30  ;;  %v1620_v56 = vld [vmem:[#allocation2 + $0xe8] sm:$0xff]  ;;  %1676 = vst [vmem:[#allocation2 + $0xa8] sm:$0xff] %v1644_v31  ;;  %v1650_v37 = vadd.f32 %v1618_v55, %v4558_v43  ;;  %v1651_v38 = vadd.f32 %v1619_v0, %v4560_v44  ;;  %v1621_v57 = vld [vmem:[#allocation2 + $0xf0] sm:$0xff] }
 0x224   : > { %1677 = vst [vmem:[#allocation2 + $0xb0] sm:$0xff] %v1645_v32  ;;  %1678 = vst [vmem:[#allocation2 + $0xb8] sm:$0xff] %v1646_v34  ;;  %v1652_v39 = vadd.f32 %v1620_v56, %v4564_v46  ;;  %v1622_v58 = vld [vmem:[#allocation2 + $0xf8] sm:$0xff]  ;;  %v1653_v40 = vadd.f32 %v1621_v57, %v4562_v45 }
 0x225   : > { %1679 = vst [vmem:[#allocation2 + $0xc0] sm:$0xff] %v1647_v33  ;;  %1680 = vst [vmem:[#allocation2 + $0xc8] sm:$0xff] %v1648_v35  ;;  %v1654_v41 = vadd.f32 %v1622_v58, %v4566_v47 }
 0x226   : > { %1681 = vst [vmem:[#allocation2 + $0xd0] sm:$0xff] %v1649_v36  ;;  %1682 = vst [vmem:[#allocation2 + $0xd8] sm:$0xff] %v1650_v37 }
 0x227   : > { %1683 = vst [vmem:[#allocation2 + $0xe0] sm:$0xff] %v1651_v38  ;;  %1684 = vst [vmem:[#allocation2 + $0xe8] sm:$0xff] %v1652_v39 }
 0x228   : > { %1685 = vst [vmem:[#allocation2 + $0xf0] sm:$0xff] %v1653_v40  ;;  %1686 = vst [vmem:[#allocation2 + $0xf8] sm:$0xff] %v1654_v41 }
 0x229 PF: > { %p3170_p10 = scmp.ne.s32.totalorder %s4144_s25, 3 }
 0x22a   : > { %v4637_v42 = vld [vmem:[#allocation8 + $0x4] ss:$16 sps:$4 sm:$0xff] (!%p3170_p10)   ;;  %v4639_v43 = vld [vmem:[#allocation8] ss:$16 sps:$4 sm:$0xff] (!%p3170_p10)   ;;  %v4085_v44 = vmov (!%p3170_p10), 0   ;;  %vm4087_vm0 = vmmov (!%p3170_p10), 0  }
 0x22b   : > { %1690 = sbr.rel (%p3170_p10) target bundleno = 2881 (0xb41), region = 76  ;;  %1919 = vmatprep.mubr.bf16.mxu0 (!%p3170_p10), %v4085_v44  ;;  %1960 = vmatprep.mubr.bf16.mxu1 (!%p3170_p10), %v4085_v44  ;;  %v4644_v45 = vld [vmem:[#allocation8 + $0x24] ss:$16 sps:$4 sm:$0xff] (!%p3170_p10)   ;;  %v4647_v46 = vld [vmem:[#allocation8 + $0x20] ss:$16 sps:$4 sm:$0xff] (!%p3170_p10)   ;;  %v1724_v26 = vld [vmem:[#allocation2 + $0x8] sm:$0xff] (!%p3170_p10) }
 0x22c   : > { %1887 = vmatprep.subr.bf16.mxu0 (!%p3170_p10), %v4637_v42  ;;  %v4650_v47 = vld [vmem:[#allocation8 + $0x44] ss:$16 sps:$4 sm:$0xff] (!%p3170_p10)   ;;  %v4652_v1 = vld [vmem:[#allocation8 + $0xc] ss:$16 sps:$4 sm:$0xff] (!%p3170_p10)   ;;  %v4654_v2 = vld [vmem:[#allocation8 + $0x8] ss:$16 sps:$4 sm:$0xff] (!%p3170_p10)  }
 0x22d   : > { %1888 = vmatpush1.bf16.msra.mxu0 (!%p3170_p10), %v4639_v43  ;;  %v4657_v3 = vld [vmem:[#allocation8 + $0x40] ss:$16 sps:$4 sm:$0xff] (!%p3170_p10)   ;;  %1928 = vmatprep.subr.bf16.mxu1 (!%p3170_p10), %v4652_v1  ;;  %v4661_v4 = vld [vmem:[#allocation8 + $0x64] ss:$16 sps:$4 sm:$0xff] (!%p3170_p10)   ;;  %v4664_v5 = vld [vmem:[#allocation8 + $0x2c] ss:$16 sps:$4 sm:$0xff] (!%p3170_p10)  }
 0x22e   : > { %1889 = vmatprep.subr.bf16.mxu0 (!%p3170_p10), %v4644_v45  ;;  %1929 = vmatpush1.bf16.msra.mxu1 (!%p3170_p10), %v4654_v2  ;;  %v4666_v6 = vld [vmem:[#allocation8 + $0x28] ss:$16 sps:$4 sm:$0xff] (!%p3170_p10)   ;;  %v4670_v7 = vld [vmem:[#allocation8 + $0x60] ss:$16 sps:$4 sm:$0xff] (!%p3170_p10)   ;;  %v4672_v8 = vld [vmem:[#allocation8 + $0x84] ss:$16 sps:$4 sm:$0xff] (!%p3170_p10)  }
 0x22f   : > { %1930 = vmatprep.subr.bf16.mxu1 (!%p3170_p10), %v4664_v5  ;;  %v4674_v9 = vld [vmem:[#allocation8 + $0x4c] ss:$16 sps:$4 sm:$0xff] (!%p3170_p10)   ;;  %v4678_v16 = vld [vmem:[#allocation8 + $0x48] ss:$16 sps:$4 sm:$0xff] (!%p3170_p10)   ;;  %v4684_v17 = vld [vmem:[#allocation8 + $0x80] ss:$16 sps:$4 sm:$0xff] (!%p3170_p10)  }
 0x230   : > { %v4681_v18 = vld [vmem:[#allocation8 + $0x6c] ss:$16 sps:$4 sm:$0xff] (!%p3170_p10)   ;;  %v4687_v10 = vld [vmem:[#allocation8 + $0xa4] ss:$16 sps:$4 sm:$0xff] (!%p3170_p10)   ;;  %v4690_v11 = vld [vmem:[#allocation8 + $0x68] ss:$16 sps:$4 sm:$0xff] (!%p3170_p10)  }
 0x231   : > { %1890 = vmatpush1.bf16.msra.mxu0 (!%p3170_p10), %v4647_v46  ;;  %v4693_v12 = vld [vmem:[#allocation8 + $0x8c] ss:$16 sps:$4 sm:$0xff] (!%p3170_p10)   ;;  %v4696_v19 = vld [vmem:[#allocation8 + $0xa0] ss:$16 sps:$4 sm:$0xff] (!%p3170_p10)   ;;  %v4698_v20 = vld [vmem:[#allocation8 + $0xc4] ss:$16 sps:$4 sm:$0xff] (!%p3170_p10)  }
 0x232   : > { %1891 = vmatprep.subr.bf16.mxu0 %v4650_v47  ;;  %1931 = vmatpush1.bf16.msra.mxu1 %v4666_v6  ;;  %v4702_v22 = vld [vmem:[#allocation8 + $0x88] ss:$16 sps:$4 sm:$0xff]   ;;  %v4705_v13 = vld [vmem:[#allocation8 + $0xac] ss:$16 sps:$4 sm:$0xff]   ;;  %v4708_v14 = vld [vmem:[#allocation8 + $0xc0] ss:$16 sps:$4 sm:$0xff]  }
 0x233   : > { %1932 = vmatprep.subr.bf16.mxu1 %v4674_v9  ;;  %v4711_v15 = vld [vmem:[#allocation8 + $0xe4] ss:$16 sps:$4 sm:$0xff]   ;;  %v4714_v21 = vld [vmem:[#allocation8 + $0xa8] ss:$16 sps:$4 sm:$0xff]   ;;  %v4717_v23 = vld [vmem:[#allocation8 + $0xcc] ss:$16 sps:$4 sm:$0xff]  }
 0x234   : > { %v4720_v24 = vld [vmem:[#allocation8 + $0xe0] ss:$16 sps:$4 sm:$0xff]   ;;  %v4724_v48 = vld [vmem:[#allocation8 + $0xc8] ss:$16 sps:$4 sm:$0xff]   ;;  %v4727_v49 = vld [vmem:[#allocation8 + $0xec] ss:$16 sps:$4 sm:$0xff]  }
 0x235   : > { %1892 = vmatpush1.bf16.msra.mxu0 %v4657_v3  ;;  %v4731_v50 = vld [vmem:[#allocation8 + $0xe8] ss:$16 sps:$4 sm:$0xff]   ;;  %v1723_v25 = vld [vmem:[#allocation2] sm:$0xff]  ;;  %v1725_v62 = vld [vmem:[#allocation2 + $0x10] sm:$0xff]  ;;  %vm2895_vm1 = vcmask 64512  }
 0x236   : > { %1893 = vmatprep.subr.bf16.mxu0 %v4661_v4  ;;  %1933 = vmatpush1.bf16.msra.mxu1 %v4678_v16  ;;  %v1726_v59 = vld [vmem:[#allocation2 + $0x18] sm:$0xff] }
 0x237   : > { %1934 = vmatprep.subr.bf16.mxu1 %v4681_v18 }
 0x239   : > { %1894 = vmatpush1.bf16.msra.mxu0 %v4670_v7 }
 0x23a   : > { %1895 = vmatprep.subr.bf16.mxu0 %v4672_v8  ;;  %1935 = vmatpush1.bf16.msra.mxu1 %v4690_v11 }
 0x23b   : > { %1936 = vmatprep.subr.bf16.mxu1 %v4693_v12 }
 0x23d   : > { %1896 = vmatpush1.bf16.msra.mxu0 %v4684_v17 }
 0x23e   : > { %1897 = vmatprep.subr.bf16.mxu0 %v4687_v10  ;;  %1937 = vmatpush1.bf16.msra.mxu1 %v4702_v22 }
 0x23f   : > { %1938 = vmatprep.subr.bf16.mxu1 %v4705_v13 }
 0x241   : > { %1898 = vmatpush1.bf16.msra.mxu0 %v4696_v19 }
 0x242   : > { %1899 = vmatprep.subr.bf16.mxu0 %v4698_v20  ;;  %1939 = vmatpush1.bf16.msra.mxu1 %v4714_v21 }
 0x243   : > { %1940 = vmatprep.subr.bf16.mxu1 %v4717_v23 }
 0x245   : > { %1900 = vmatpush1.bf16.msra.mxu0 %v4708_v14 }
 0x246   : > { %1901 = vmatprep.subr.bf16.mxu0 %v4711_v15  ;;  %1941 = vmatpush1.bf16.msra.mxu1 %v4724_v48 }
 0x247   : > { %1942 = vmatprep.subr.bf16.mxu1 %v4727_v49 }
 0x249   : > { %1902 = vmatpush1.bf16.msra.mxu0 %v4720_v24 }
 0x24a   : > { %2002 = vmatprep.subr.bf16.mxu0 %v4637_v42  ;;  %1943 = vmatpush1.bf16.msra.mxu1 %v4731_v50 }
 0x24b   : > { %2043 = vmatprep.subr.bf16.mxu1 %v4652_v1 }
 0x24c   : > { %1920 = vmatmul.mubr.bf16.vlgmr.msra.gmra.mrb[0].mxu0 %v4085_v44 }
 0x24d   : > { %2003 = vmatpush1.bf16.msra.mxu0 %v4639_v43  ;;  %2034 = vmatprep.mubr.bf16.mxu0 %v4085_v44 }
 0x24e   : > { %2004 = vmatprep.subr.bf16.mxu0 %v4644_v45  ;;  %1961 = vmatmul.mubr.bf16.vlgmr.msra.gmra.mrb[0].mxu1 %v4085_v44 }
 0x24f   : > { %2044 = vmatpush1.bf16.msra.mxu1 %v4654_v2  ;;  %2075 = vmatprep.mubr.bf16.mxu1 %v4085_v44 }
 0x250   : > { %2045 = vmatprep.subr.bf16.mxu1 %v4664_v5 }
 0x251   : > { %2005 = vmatpush1.bf16.msra.mxu0 %v4647_v46 }
 0x252   : > { %2006 = vmatprep.subr.bf16.mxu0 %v4650_v47 }
 0x253   : > { %2046 = vmatpush1.bf16.msra.mxu1 %v4666_v6 }
 0x254   : > { %2047 = vmatprep.subr.bf16.mxu1 %v4674_v9 }
 0x255   : > { %2007 = vmatpush1.bf16.msra.mxu0 %v4657_v3 }
 0x256   : > { %2008 = vmatprep.subr.bf16.mxu0 %v4661_v4 }
 0x257   : > { %2048 = vmatpush1.bf16.msra.mxu1 %v4678_v16 }
 0x258   : > { %2049 = vmatprep.subr.bf16.mxu1 %v4681_v18 }
 0x259   : > { %2009 = vmatpush1.bf16.msra.mxu0 %v4670_v7 }
 0x25a   : > { %2010 = vmatprep.subr.bf16.mxu0 %v4672_v8 }
 0x25b   : > { %2050 = vmatpush1.bf16.msra.mxu1 %v4690_v11 }
 0x25c   : > { %2051 = vmatprep.subr.bf16.mxu1 %v4693_v12 }
 0x25d   : > { %2011 = vmatpush1.bf16.msra.mxu0 %v4684_v17 }
 0x25e   : > { %2012 = vmatprep.subr.bf16.mxu0 %v4687_v10 }
 0x25f   : > { %2052 = vmatpush1.bf16.msra.mxu1 %v4702_v22 }
 0x260   : > { %2053 = vmatprep.subr.bf16.mxu1 %v4705_v13 }
 0x261   : > { %2013 = vmatpush1.bf16.msra.mxu0 %v4696_v19 }
 0x262   : > { %2014 = vmatprep.subr.bf16.mxu0 %v4698_v20 }
 0x263   : > { %2054 = vmatpush1.bf16.msra.mxu1 %v4714_v21 }
 0x264   : > { %2055 = vmatprep.subr.bf16.mxu1 %v4717_v23 }
 0x265   : > { %2015 = vmatpush1.bf16.msra.mxu0 %v4708_v14 }
 0x266   : > { %2016 = vmatprep.subr.bf16.mxu0 %v4711_v15 }
 0x267   : > { %2056 = vmatpush1.bf16.msra.mxu1 %v4724_v48 }
 0x268   : > { %2057 = vmatprep.subr.bf16.mxu1 %v4727_v49 }
 0x269   : > { %2017 = vmatpush1.bf16.msra.mxu0 %v4720_v24 }
 0x26a   : > { %2117 = vmatprep.subr.bf16.mxu0 %v4637_v42 }
 0x26b   : > { %2058 = vmatpush1.bf16.msra.mxu1 %v4731_v50 }
 0x26c   : > { %2158 = vmatprep.subr.bf16.mxu1 %v4652_v1 }
 0x31f   : > { %v1921_v27 = vpop.f32.mrb[0].mxu0 }
 0x320   : > { %v1969_v51 = vadd.f32 %v1921_v27, %v1723_v25  ;;  %v1923_v52 = vpop.f32.mrb[1].mxu0 }
 0x321   : > { %v1970_v53 = vadd.f32 %v1923_v52, %v1724_v26  ;;  %v1925_v28 = vpop.f32.mrb[2].mxu0  ;;  %v1962_v60 = vpop.f32.mrb[0].mxu1  ;;  %v1997_v52 = vld [vmem:[#allocation2 + $0x20] sm:$0xff] }
 0x322   : > { %v3203_v29 = vmul.f32 -1.442695, %v1969_v51  ;;  %v1926_v30 = vpop.f32.mrb[3].mxu0  ;;  %v1964_v31 = vpop.f32.mrb[1].mxu1  ;;  %v1971_v33 = vadd.f32 %v1962_v60, %v1725_v62 }
 0x323   : > { %v3204_v54 = vmul.f32 -1.442695, %v1970_v53  ;;  %v1972_v32 = vadd.f32 %v1964_v31, %v1726_v59  ;;  %v1966_v34 = vpop.f32.mrb[2].mxu1  ;;  %v1998_v53 = vld [vmem:[#allocation2 + $0x28] sm:$0xff] }
 0x324   : > { %3696 = vpow2.f32 %v3203_v29  ;;  %v1967_v61 = vpop.f32.mrb[3].mxu1 }
 0x325   : > { %3698 = vpow2.f32 %v3204_v54  ;;  %v3205_v63 = vmul.f32 -1.442695, %v1972_v32 }
 0x327   : > { %3700 = vpow2.f32 %v3205_v63 }
 0x328   : > { %3702 = vtanh.f32 %v1971_v33  ;;  %v2000_v33 = vld [vmem:[#allocation2 + $0x38] sm:$0xff] }
 0x32e   : > { %v3697_v35 = vpop.eup %3696 }
 0x32f   : > { %v3699_v36 = vpop.eup %3698  ;;  %v1976_v55 = vadd.f32 1.0, %v3697_v35 }
 0x330   : > { %v1982_v0 = vadd.f32 1.0, %v3699_v36  ;;  %v1999_v36 = vld [vmem:[#allocation2 + $0x30] sm:$0xff] }
 0x331   : > { %3704 = vrcp.f32 %v1976_v55  ;;  %v3701_v56 = vpop.eup %3700 }
 0x332   : > { %3706 = vrcp.f32 %v1982_v0  ;;  %v3703_v37 = vpop.eup %3702  ;;  %v1989_v39 = vadd.f32 1.0, %v3701_v56 }
 0x334   : > { %3708 = vrcp.f32 %v1989_v39 }
 0x33b   : > { %v3705_v38 = vpop.eup %3704 }
 0x33c   : > { %v3707_v57 = vpop.eup %3706  ;;  %v1993_v58 = vmul.f32 %v3705_v38, %v3703_v37 }
 0x33d   : > { %v1992_v40 = vmul.f32 0.0, %v3707_v57 }
 0x33e   : > { %v3709_v25 = vpop.eup %3708 }
 0x33f   : > { %v4773_v41 = vadd.f32 %v1993_v58, %v1992_v40 }
 0x341   : > { %3710 = vtanh.f32 %v4773_v41 }
 0x34b   : > { %v3711_v26 = vpop.eup %3710 }
 0x34c   : > { %v1996_v27 = vmul.f32 %v3711_v26, %v3709_v25 }
 0x34e   : > { %v2001_v51 = vpack.c.bf16 %v1996_v27, %v1996_v27 }
 0x350   : > { %2035 = vmatmul.mubr.bf16.vlgmr.msra.gmra.mrb[4].mxu0 %v2001_v51  ;;  %2076 = vmatmul.mubr.bf16.vlgmr.msra.gmra.mrb[4].mxu1 %v2001_v51 }
 0x351   : > { %2118 = vmatpush1.bf16.msra.mxu0 %v4639_v43  ;;  %2159 = vmatpush1.bf16.msra.mxu1 %v4654_v2 }
 0x352   : > { %2119 = vmatprep.subr.bf16.mxu0 %v4644_v45  ;;  %2160 = vmatprep.subr.bf16.mxu1 %v4664_v5 }
 0x353   : > { %2149 = vmatprep.mubr.bf16.mxu0 %v4085_v44  ;;  %2190 = vmatprep.mubr.bf16.mxu1 %v4085_v44 }
 0x355   : > { %2120 = vmatpush1.bf16.msra.mxu0 %v4647_v46  ;;  %2161 = vmatpush1.bf16.msra.mxu1 %v4666_v6 }
 0x356   : > { %2121 = vmatprep.subr.bf16.mxu0 %v4650_v47  ;;  %2162 = vmatprep.subr.bf16.mxu1 %v4674_v9 }
 0x359   : > { %2122 = vmatpush1.bf16.msra.mxu0 %v4657_v3  ;;  %2163 = vmatpush1.bf16.msra.mxu1 %v4678_v16 }
 0x35a   : > { %2123 = vmatprep.subr.bf16.mxu0 %v4661_v4  ;;  %2164 = vmatprep.subr.bf16.mxu1 %v4681_v18 }
 0x35d   : > { %2124 = vmatpush1.bf16.msra.mxu0 %v4670_v7  ;;  %2165 = vmatpush1.bf16.msra.mxu1 %v4690_v11 }
 0x35e   : > { %2125 = vmatprep.subr.bf16.mxu0 %v4672_v8  ;;  %2166 = vmatprep.subr.bf16.mxu1 %v4693_v12 }
 0x361   : > { %2126 = vmatpush1.bf16.msra.mxu0 %v4684_v17  ;;  %2167 = vmatpush1.bf16.msra.mxu1 %v4702_v22 }
 0x362   : > { %2127 = vmatprep.subr.bf16.mxu0 %v4687_v10  ;;  %2168 = vmatprep.subr.bf16.mxu1 %v4705_v13 }
 0x365   : > { %2128 = vmatpush1.bf16.msra.mxu0 %v4696_v19  ;;  %2169 = vmatpush1.bf16.msra.mxu1 %v4714_v21 }
 0x366   : > { %2129 = vmatprep.subr.bf16.mxu0 %v4698_v20  ;;  %2170 = vmatprep.subr.bf16.mxu1 %v4717_v23 }
 0x369   : > { %2130 = vmatpush1.bf16.msra.mxu0 %v4708_v14  ;;  %2171 = vmatpush1.bf16.msra.mxu1 %v4724_v48 }
 0x36a   : > { %2131 = vmatprep.subr.bf16.mxu0 %v4711_v15  ;;  %2172 = vmatprep.subr.bf16.mxu1 %v4727_v49 }
 0x36d   : > { %2132 = vmatpush1.bf16.msra.mxu0 %v4720_v24  ;;  %2173 = vmatpush1.bf16.msra.mxu1 %v4731_v50 }
 0x36e   : > { %2232 = vmatprep.subr.bf16.mxu0 %v4637_v42  ;;  %2273 = vmatprep.subr.bf16.mxu1 %v4652_v1 }
 0x423   : > { %v2036_v28 = vpop.f32.mrb[4].mxu0  ;;  %v2077_v29 = vpop.f32.mrb[4].mxu1 }
 0x424   : > { %v2084_v30 = vadd.f32 %v2036_v28, %v1997_v52  ;;  %v2038_v54 = vpop.f32.mrb[5].mxu0  ;;  %v2079_v59 = vpop.f32.mrb[5].mxu1  ;;  %v2086_v0 = vadd.f32 %v2077_v29, %v1999_v36 }
 0x425   : > { %v2085_v60 = vadd.f32 %v2038_v54, %v1998_v53  ;;  %v2040_v31 = vpop.f32.mrb[6].mxu0  ;;  %v2081_v32 = vpop.f32.mrb[6].mxu1  ;;  %v2087_v35 = vadd.f32 %v2079_v59, %v2000_v33  ;;  %v2113_v54 = vld [vmem:[#allocation2 + $0x48] sm:$0xff] }
 0x426   : > { %v3206_v34 = vmul.f32 -1.442695, %v2084_v30  ;;  %v2041_v61 = vpop.f32.mrb[7].mxu0  ;;  %v2082_v62 = vpop.f32.mrb[7].mxu1 }
 0x427   : > { %v3207_v63 = vmul.f32 -1.442695, %v2085_v60  ;;  %v3208_v55 = vmul.f32 -1.442695, %v2087_v35 }
 0x428   : > { %3712 = vpow2.f32 %v3206_v34 }
 0x429   : > { %3714 = vpow2.f32 %v3207_v63 }
 0x42a   : > { %3716 = vpow2.f32 %v3208_v55 }
 0x42b   : > { %3718 = vtanh.f32 %v2086_v0  ;;  %v2115_v0 = vld [vmem:[#allocation2 + $0x58] sm:$0xff] }
 0x432   : > { %v3713_v56 = vpop.eup %3712 }
 0x433   : > { %v3715_v37 = vpop.eup %3714  ;;  %v2091_v38 = vadd.f32 1.0, %v3713_v56 }
 0x434   : > { %v2097_v39 = vadd.f32 1.0, %v3715_v37  ;;  %v3717_v57 = vpop.eup %3716  ;;  %v2114_v37 = vld [vmem:[#allocation2 + $0x50] sm:$0xff] }
 0x435   : > { %3720 = vrcp.f32 %v2091_v38  ;;  %v3719_v58 = vpop.eup %3718  ;;  %v2104_v27 = vadd.f32 1.0, %v3717_v57 }
 0x436   : > { %3722 = vrcp.f32 %v2097_v39 }
 0x437   : > { %3724 = vrcp.f32 %v2104_v27 }
 0x43f   : > { %v3721_v40 = vpop.eup %3720 }
 0x440   : > { %v3723_v25 = vpop.eup %3722  ;;  %v2108_v26 = vmul.f32 %v3721_v40, %v3719_v58 }
 0x441   : > { %v2107_v51 = vmul.f32 %v3723_v25, %v4773_v41  ;;  %v3725_v53 = vpop.eup %3724  ;;  %v2112_v41 = vld [vmem:[#allocation2 + $0x40] sm:$0xff] }
 0x443   : > { %v4811_v52 = vadd.f32 %v2108_v26, %v2107_v51 }
 0x445   : > { %3726 = vtanh.f32 %v4811_v52 }
 0x44f   : > { %v3727_v28 = vpop.eup %3726 }
 0x450   : > { %v2111_v29 = vmul.f32 %v3727_v28, %v3725_v53 }
 0x452   : > { %v2116_v30 = vpack.c.bf16 %v2111_v29, %v2111_v29 }
 0x454   : > { %2150 = vmatmul.mubr.bf16.vlgmr.msra.gmra.mrb[8].mxu0 %v2116_v30  ;;  %2191 = vmatmul.mubr.bf16.vlgmr.msra.gmra.mrb[8].mxu1 %v2116_v30 }
 0x455   : > { %2233 = vmatpush1.bf16.msra.mxu0 %v4639_v43  ;;  %2274 = vmatpush1.bf16.msra.mxu1 %v4654_v2 }
 0x456   : > { %2234 = vmatprep.subr.bf16.mxu0 %v4644_v45  ;;  %2275 = vmatprep.subr.bf16.mxu1 %v4664_v5 }
 0x457   : > { %2264 = vmatprep.mubr.bf16.mxu0 %v4085_v44  ;;  %2305 = vmatprep.mubr.bf16.mxu1 %v4085_v44 }
 0x459   : > { %2235 = vmatpush1.bf16.msra.mxu0 %v4647_v46  ;;  %2276 = vmatpush1.bf16.msra.mxu1 %v4666_v6 }
 0x45a   : > { %2236 = vmatprep.subr.bf16.mxu0 %v4650_v47  ;;  %2277 = vmatprep.subr.bf16.mxu1 %v4674_v9 }
 0x45d   : > { %2237 = vmatpush1.bf16.msra.mxu0 %v4657_v3  ;;  %2278 = vmatpush1.bf16.msra.mxu1 %v4678_v16 }
 0x45e   : > { %2238 = vmatprep.subr.bf16.mxu0 %v4661_v4  ;;  %2279 = vmatprep.subr.bf16.mxu1 %v4681_v18 }
 0x461   : > { %2239 = vmatpush1.bf16.msra.mxu0 %v4670_v7  ;;  %2280 = vmatpush1.bf16.msra.mxu1 %v4690_v11 }
 0x462   : > { %2240 = vmatprep.subr.bf16.mxu0 %v4672_v8  ;;  %2281 = vmatprep.subr.bf16.mxu1 %v4693_v12 }
 0x465   : > { %2241 = vmatpush1.bf16.msra.mxu0 %v4684_v17  ;;  %2282 = vmatpush1.bf16.msra.mxu1 %v4702_v22 }
 0x466   : > { %2242 = vmatprep.subr.bf16.mxu0 %v4687_v10  ;;  %2283 = vmatprep.subr.bf16.mxu1 %v4705_v13 }
 0x469   : > { %2243 = vmatpush1.bf16.msra.mxu0 %v4696_v19  ;;  %2284 = vmatpush1.bf16.msra.mxu1 %v4714_v21 }
 0x46a   : > { %2244 = vmatprep.subr.bf16.mxu0 %v4698_v20  ;;  %2285 = vmatprep.subr.bf16.mxu1 %v4717_v23 }
 0x46d   : > { %2245 = vmatpush1.bf16.msra.mxu0 %v4708_v14  ;;  %2286 = vmatpush1.bf16.msra.mxu1 %v4724_v48 }
 0x46e   : > { %2246 = vmatprep.subr.bf16.mxu0 %v4711_v15  ;;  %2287 = vmatprep.subr.bf16.mxu1 %v4727_v49 }
 0x471   : > { %2247 = vmatpush1.bf16.msra.mxu0 %v4720_v24  ;;  %2288 = vmatpush1.bf16.msra.mxu1 %v4731_v50 }
 0x472   : > { %2347 = vmatprep.subr.bf16.mxu0 %v4637_v42  ;;  %2388 = vmatprep.subr.bf16.mxu1 %v4652_v1 }
 0x527   : > { %v2151_v59 = vpop.f32.mrb[8].mxu0  ;;  %v2192_v60 = vpop.f32.mrb[8].mxu1 }
 0x528   : > { %v2199_v31 = vadd.f32 %v2151_v59, %v2112_v41  ;;  %v2153_v32 = vpop.f32.mrb[9].mxu0  ;;  %v2194_v34 = vpop.f32.mrb[9].mxu1  ;;  %v2201_v39 = vadd.f32 %v2192_v60, %v2114_v37 }
 0x529   : > { %v2200_v61 = vadd.f32 %v2153_v32, %v2113_v54  ;;  %v2155_v62 = vpop.f32.mrb[10].mxu0  ;;  %v2196_v63 = vpop.f32.mrb[10].mxu1  ;;  %v2202_v56 = vadd.f32 %v2194_v34, %v2115_v0  ;;  %v2228_v32 = vld [vmem:[#allocation2 + $0x68] sm:$0xff] }
 0x52a   : > { %v3209_v33 = vmul.f32 -1.442695, %v2199_v31  ;;  %v2156_v35 = vpop.f32.mrb[11].mxu0  ;;  %v2197_v36 = vpop.f32.mrb[11].mxu1 }
 0x52b   : > { %v3210_v55 = vmul.f32 -1.442695, %v2200_v61  ;;  %v3211_v38 = vmul.f32 -1.442695, %v2202_v56 }
 0x52c   : > { %3728 = vpow2.f32 %v3209_v33 }
 0x52d   : > { %3730 = vpow2.f32 %v3210_v55 }
 0x52e   : > { %3732 = vpow2.f32 %v3211_v38 }
 0x52f   : > { %3734 = vtanh.f32 %v2201_v39  ;;  %v2230_v39 = vld [vmem:[#allocation2 + $0x78] sm:$0xff] }
 0x536   : > { %v3729_v57 = vpop.eup %3728 }
 0x537   : > { %v3731_v58 = vpop.eup %3730  ;;  %v2206_v40 = vadd.f32 1.0, %v3729_v57 }
 0x538   : > { %v2212_v25 = vadd.f32 1.0, %v3731_v58  ;;  %v3733_v26 = vpop.eup %3732  ;;  %v2229_v58 = vld [vmem:[#allocation2 + $0x70] sm:$0xff] }
 0x539   : > { %3736 = vrcp.f32 %v2206_v40  ;;  %v3735_v27 = vpop.eup %3734  ;;  %v2219_v29 = vadd.f32 1.0, %v3733_v26 }
 0x53a   : > { %3738 = vrcp.f32 %v2212_v25 }
 0x53b   : > { %3740 = vrcp.f32 %v2219_v29 }
 0x543   : > { %v3737_v51 = vpop.eup %3736 }
 0x544   : > { %v3739_v53 = vpop.eup %3738  ;;  %v2223_v28 = vmul.f32 %v3737_v51, %v3735_v27 }
 0x545   : > { %v2222_v30 = vmul.f32 %v3739_v53, %v4811_v52  ;;  %v3741_v54 = vpop.eup %3740  ;;  %v2227_v52 = vld [vmem:[#allocation2 + $0x60] sm:$0xff] }
 0x547   : > { %v4849_v41 = vadd.f32 %v2223_v28, %v2222_v30 }
 0x549   : > { %3742 = vtanh.f32 %v4849_v41 }
 0x553   : > { %v3743_v59 = vpop.eup %3742 }
 0x554   : > { %v2226_v60 = vmul.f32 %v3743_v59, %v3741_v54 }
 0x556   : > { %v2231_v31 = vpack.c.bf16 %v2226_v60, %v2226_v60 }
 0x558   : > { %2265 = vmatmul.mubr.bf16.vlgmr.msra.gmra.mrb[12].mxu0 %v2231_v31  ;;  %2306 = vmatmul.mubr.bf16.vlgmr.msra.gmra.mrb[12].mxu1 %v2231_v31 }
 0x559   : > { %2348 = vmatpush1.bf16.msra.mxu0 %v4639_v43  ;;  %2389 = vmatpush1.bf16.msra.mxu1 %v4654_v2 }
 0x55a   : > { %2349 = vmatprep.subr.bf16.mxu0 %v4644_v45  ;;  %2390 = vmatprep.subr.bf16.mxu1 %v4664_v5 }
 0x55b   : > { %2379 = vmatprep.mubr.bf16.mxu0 %v4085_v44  ;;  %2420 = vmatprep.mubr.bf16.mxu1 %v4085_v44 }
 0x55d   : > { %2350 = vmatpush1.bf16.msra.mxu0 %v4647_v46  ;;  %2391 = vmatpush1.bf16.msra.mxu1 %v4666_v6 }
 0x55e   : > { %2351 = vmatprep.subr.bf16.mxu0 %v4650_v47  ;;  %2392 = vmatprep.subr.bf16.mxu1 %v4674_v9 }
 0x561   : > { %2352 = vmatpush1.bf16.msra.mxu0 %v4657_v3  ;;  %2393 = vmatpush1.bf16.msra.mxu1 %v4678_v16 }
 0x562   : > { %2353 = vmatprep.subr.bf16.mxu0 %v4661_v4  ;;  %2394 = vmatprep.subr.bf16.mxu1 %v4681_v18 }
 0x565   : > { %2354 = vmatpush1.bf16.msra.mxu0 %v4670_v7  ;;  %2395 = vmatpush1.bf16.msra.mxu1 %v4690_v11 }
 0x566   : > { %2355 = vmatprep.subr.bf16.mxu0 %v4672_v8  ;;  %2396 = vmatprep.subr.bf16.mxu1 %v4693_v12 }
 0x569   : > { %2356 = vmatpush1.bf16.msra.mxu0 %v4684_v17  ;;  %2397 = vmatpush1.bf16.msra.mxu1 %v4702_v22 }
 0x56a   : > { %2357 = vmatprep.subr.bf16.mxu0 %v4687_v10  ;;  %2398 = vmatprep.subr.bf16.mxu1 %v4705_v13 }
 0x56d   : > { %2358 = vmatpush1.bf16.msra.mxu0 %v4696_v19  ;;  %2399 = vmatpush1.bf16.msra.mxu1 %v4714_v21 }
 0x56e   : > { %2359 = vmatprep.subr.bf16.mxu0 %v4698_v20  ;;  %2400 = vmatprep.subr.bf16.mxu1 %v4717_v23 }
 0x571   : > { %2360 = vmatpush1.bf16.msra.mxu0 %v4708_v14  ;;  %2401 = vmatpush1.bf16.msra.mxu1 %v4724_v48 }
 0x572   : > { %2361 = vmatprep.subr.bf16.mxu0 %v4711_v15  ;;  %2402 = vmatprep.subr.bf16.mxu1 %v4727_v49 }
 0x575   : > { %2362 = vmatpush1.bf16.msra.mxu0 %v4720_v24  ;;  %2403 = vmatpush1.bf16.msra.mxu1 %v4731_v50 }
 0x576   : > { %2462 = vmatprep.subr.bf16.mxu0 %v4637_v42  ;;  %2503 = vmatprep.subr.bf16.mxu1 %v4652_v1 }
 0x62b   : > { %v2266_v34 = vpop.f32.mrb[12].mxu0  ;;  %v2307_v61 = vpop.f32.mrb[12].mxu1 }
 0x62c   : > { %v2314_v62 = vadd.f32 %v2266_v34, %v2227_v52  ;;  %v2268_v63 = vpop.f32.mrb[13].mxu0  ;;  %v2309_v33 = vpop.f32.mrb[13].mxu1  ;;  %v2316_v25 = vadd.f32 %v2307_v61, %v2229_v58 }
 0x62d   : > { %v2315_v35 = vadd.f32 %v2268_v63, %v2228_v32  ;;  %v2270_v36 = vpop.f32.mrb[14].mxu0  ;;  %v2311_v55 = vpop.f32.mrb[14].mxu1  ;;  %v2317_v57 = vadd.f32 %v2309_v33, %v2230_v39  ;;  %v2343_v63 = vld [vmem:[#allocation2 + $0x88] sm:$0xff] }
 0x62e   : > { %v3212_v0 = vmul.f32 -1.442695, %v2314_v62  ;;  %v2271_v56 = vpop.f32.mrb[15].mxu0  ;;  %v2312_v37 = vpop.f32.mrb[15].mxu1 }
 0x62f   : > { %v3213_v38 = vmul.f32 -1.442695, %v2315_v35  ;;  %v3214_v40 = vmul.f32 -1.442695, %v2317_v57 }
 0x630   : > { %3744 = vpow2.f32 %v3212_v0 }
 0x631   : > { %3746 = vpow2.f32 %v3213_v38 }
 0x632   : > { %3748 = vpow2.f32 %v3214_v40 }
 0x633   : > { %3750 = vtanh.f32 %v2316_v25  ;;  %v2345_v25 = vld [vmem:[#allocation2 + $0x98] sm:$0xff] }
 0x63a   : > { %v3745_v26 = vpop.eup %3744 }
 0x63b   : > { %v3747_v27 = vpop.eup %3746  ;;  %v2321_v51 = vadd.f32 1.0, %v3745_v26  ;;  %v2344_v26 = vld [vmem:[#allocation2 + $0x90] sm:$0xff] }
 0x63c   : > { %v2327_v53 = vadd.f32 1.0, %v3747_v27  ;;  %v3749_v28 = vpop.eup %3748 }
 0x63d   : > { %3752 = vrcp.f32 %v2321_v51  ;;  %v3751_v29 = vpop.eup %3750  ;;  %v2334_v60 = vadd.f32 1.0, %v3749_v28 }
 0x63e   : > { %3754 = vrcp.f32 %v2327_v53 }
 0x63f   : > { %3756 = vrcp.f32 %v2334_v60 }
 0x647   : > { %v3753_v30 = vpop.eup %3752 }
 0x648   : > { %v3755_v54 = vpop.eup %3754  ;;  %v2338_v59 = vmul.f32 %v3753_v30, %v3751_v29 }
 0x649   : > { %v2337_v31 = vmul.f32 %v3755_v54, %v4849_v41  ;;  %v3757_v32 = vpop.eup %3756  ;;  %v2342_v41 = vld [vmem:[#allocation2 + $0x80] sm:$0xff] }
 0x64b   : > { %v4887_v52 = vadd.f32 %v2338_v59, %v2337_v31 }
 0x64d   : > { %3758 = vtanh.f32 %v4887_v52 }
 0x657   : > { %v3759_v34 = vpop.eup %3758 }
 0x658   : > { %v2341_v61 = vmul.f32 %v3759_v34, %v3757_v32 }
 0x65a   : > { %v2346_v62 = vpack.c.bf16 %v2341_v61, %v2341_v61 }
 0x65c   : > { %2380 = vmatmul.mubr.bf16.vlgmr.msra.gmra.mrb[16].mxu0 %v2346_v62  ;;  %2421 = vmatmul.mubr.bf16.vlgmr.msra.gmra.mrb[16].mxu1 %v2346_v62 }
 0x65d   : > { %2463 = vmatpush1.bf16.msra.mxu0 %v4639_v43  ;;  %2504 = vmatpush1.bf16.msra.mxu1 %v4654_v2 }
 0x65e   : > { %2464 = vmatprep.subr.bf16.mxu0 %v4644_v45  ;;  %2505 = vmatprep.subr.bf16.mxu1 %v4664_v5 }
 0x65f   : > { %2494 = vmatprep.mubr.bf16.mxu0 %v4085_v44  ;;  %2535 = vmatprep.mubr.bf16.mxu1 %v4085_v44 }
 0x661   : > { %2465 = vmatpush1.bf16.msra.mxu0 %v4647_v46  ;;  %2506 = vmatpush1.bf16.msra.mxu1 %v4666_v6 }
 0x662   : > { %2466 = vmatprep.subr.bf16.mxu0 %v4650_v47  ;;  %2507 = vmatprep.subr.bf16.mxu1 %v4674_v9 }
 0x665   : > { %2467 = vmatpush1.bf16.msra.mxu0 %v4657_v3  ;;  %2508 = vmatpush1.bf16.msra.mxu1 %v4678_v16 }
 0x666   : > { %2468 = vmatprep.subr.bf16.mxu0 %v4661_v4  ;;  %2509 = vmatprep.subr.bf16.mxu1 %v4681_v18 }
 0x669   : > { %2469 = vmatpush1.bf16.msra.mxu0 %v4670_v7  ;;  %2510 = vmatpush1.bf16.msra.mxu1 %v4690_v11 }
 0x66a   : > { %2470 = vmatprep.subr.bf16.mxu0 %v4672_v8  ;;  %2511 = vmatprep.subr.bf16.mxu1 %v4693_v12 }
 0x66d   : > { %2471 = vmatpush1.bf16.msra.mxu0 %v4684_v17  ;;  %2512 = vmatpush1.bf16.msra.mxu1 %v4702_v22 }
 0x66e   : > { %2472 = vmatprep.subr.bf16.mxu0 %v4687_v10  ;;  %2513 = vmatprep.subr.bf16.mxu1 %v4705_v13 }
 0x671   : > { %2473 = vmatpush1.bf16.msra.mxu0 %v4696_v19  ;;  %2514 = vmatpush1.bf16.msra.mxu1 %v4714_v21 }
 0x672   : > { %2474 = vmatprep.subr.bf16.mxu0 %v4698_v20  ;;  %2515 = vmatprep.subr.bf16.mxu1 %v4717_v23 }
 0x675   : > { %2475 = vmatpush1.bf16.msra.mxu0 %v4708_v14  ;;  %2516 = vmatpush1.bf16.msra.mxu1 %v4724_v48 }
 0x676   : > { %2476 = vmatprep.subr.bf16.mxu0 %v4711_v15  ;;  %2517 = vmatprep.subr.bf16.mxu1 %v4727_v49 }
 0x679   : > { %2477 = vmatpush1.bf16.msra.mxu0 %v4720_v24  ;;  %2518 = vmatpush1.bf16.msra.mxu1 %v4731_v50 }
 0x67a   : > { %2577 = vmatprep.subr.bf16.mxu0 %v4637_v42  ;;  %2618 = vmatprep.subr.bf16.mxu1 %v4652_v1 }
 0x72f   : > { %v2381_v33 = vpop.f32.mrb[16].mxu0  ;;  %v2422_v35 = vpop.f32.mrb[16].mxu1 }
 0x730   : > { %v2429_v36 = vadd.f32 %v2381_v33, %v2342_v41  ;;  %v2383_v55 = vpop.f32.mrb[17].mxu0  ;;  %v2424_v0 = vpop.f32.mrb[17].mxu1  ;;  %v2431_v51 = vadd.f32 %v2422_v35, %v2344_v26  ;;  %v3833_v26 = vld [vmem:[#allocation8 + $0x40] ss:$16 sps:$4 sm:$0xff]  }
 0x731   : > { %v2430_v56 = vadd.f32 %v2383_v55, %v2343_v63  ;;  %v2385_v37 = vpop.f32.mrb[18].mxu0  ;;  %v2426_v38 = vpop.f32.mrb[18].mxu1  ;;  %v2432_v42 = vadd.f32 %v2424_v0, %v2345_v25  ;;  %v3831_v25 = vld [vmem:[#allocation8 + $0x44] ss:$16 sps:$4 sm:$0xff]  }
 0x732   : > { %v3215_v39 = vmul.f32 -1.442695, %v2429_v36  ;;  %v2386_v57 = vpop.f32.mrb[19].mxu0  ;;  %v2427_v58 = vpop.f32.mrb[19].mxu1  ;;  %v3825_v37 = vld [vmem:[#allocation8] ss:$16 sps:$4 sm:$0xff]  }
 0x733   : > { %v3216_v40 = vmul.f32 -1.442695, %v2430_v56  ;;  %v3217_v27 = vmul.f32 -1.442695, %v2432_v42  ;;  %v3826_v38 = vld [vmem:[#allocation8 + $0x8] ss:$16 sps:$4 sm:$0xff]  }
 0x734   : > { %3760 = vpow2.f32 %v3215_v39  ;;  %v3827_v39 = vld [vmem:[#allocation8 + $0x24] ss:$16 sps:$4 sm:$0xff]   ;;  %v3828_v57 = vld [vmem:[#allocation8 + $0x2c] ss:$16 sps:$4 sm:$0xff]   ;;  %v3829_v58 = vld [vmem:[#allocation8 + $0x20] ss:$16 sps:$4 sm:$0xff]  }
 0x735   : > { %3762 = vpow2.f32 %v3216_v40  ;;  %v3830_v40 = vld [vmem:[#allocation8 + $0x28] ss:$16 sps:$4 sm:$0xff]   ;;  %v3832_v42 = vld [vmem:[#allocation8 + $0x4c] ss:$16 sps:$4 sm:$0xff]  }
 0x736   : > { %3764 = vpow2.f32 %v3217_v27  ;;  %v3834_v27 = vld [vmem:[#allocation8 + $0x48] ss:$16 sps:$4 sm:$0xff]  }
 0x737   : > { %3766 = vtanh.f32 %v2431_v51  ;;  %v3835_v51 = vld [vmem:[#allocation8 + $0x64] ss:$16 sps:$4 sm:$0xff]  }
 0x73e   : > { %v3761_v53 = vpop.eup %3760 }
 0x73f   : > { %v3763_v28 = vpop.eup %3762  ;;  %v2436_v29 = vadd.f32 1.0, %v3761_v53  ;;  %v3836_v53 = vld [vmem:[#allocation8 + $0x6c] ss:$16 sps:$4 sm:$0xff]  }
 0x740   : > { %v2442_v30 = vadd.f32 1.0, %v3763_v28  ;;  %v3765_v54 = vpop.eup %3764  ;;  %v3837_v28 = vld [vmem:[#allocation8 + $0x60] ss:$16 sps:$4 sm:$0xff]  }
 0x741   : > { %3768 = vrcp.f32 %v2436_v29  ;;  %v3767_v59 = vpop.eup %3766  ;;  %v2449_v34 = vadd.f32 1.0, %v3765_v54  ;;  %v3838_v29 = vld [vmem:[#allocation8 + $0x68] ss:$16 sps:$4 sm:$0xff]   ;;  %v3841_v54 = vld [vmem:[#allocation8 + $0x80] ss:$16 sps:$4 sm:$0xff]  }
 0x742   : > { %3770 = vrcp.f32 %v2442_v30  ;;  %v3840_v30 = vld [vmem:[#allocation8 + $0x8c] ss:$16 sps:$4 sm:$0xff]  }
 0x743   : > { %3772 = vrcp.f32 %v2449_v34  ;;  %v3846_v34 = vld [vmem:[#allocation8 + $0xa8] ss:$16 sps:$4 sm:$0xff]  }
 0x74b   : > { %v3769_v60 = vpop.eup %3768 }
 0x74c   : > { %v3771_v31 = vpop.eup %3770  ;;  %v2453_v32 = vmul.f32 %v3769_v60, %v3767_v59  ;;  %v3842_v59 = vld [vmem:[#allocation8 + $0x88] ss:$16 sps:$4 sm:$0xff]   ;;  %v3843_v60 = vld [vmem:[#allocation8 + $0xa4] ss:$16 sps:$4 sm:$0xff]  }
 0x74d   : > { %v2452_v61 = vmul.f32 %v3771_v31, %v4887_v52  ;;  %v3773_v41 = vpop.eup %3772  ;;  %v3844_v31 = vld [vmem:[#allocation8 + $0xac] ss:$16 sps:$4 sm:$0xff]  }
 0x74f   : > { %v4925_v62 = vadd.f32 %v2453_v32, %v2452_v61  ;;  %v3845_v32 = vld [vmem:[#allocation8 + $0xa0] ss:$16 sps:$4 sm:$0xff]   ;;  %v3847_v61 = vld [vmem:[#allocation8 + $0xc4] ss:$16 sps:$4 sm:$0xff]  }
 0x751   : > { %3774 = vtanh.f32 %v4925_v62 }
 0x75b   : > { %v3775_v63 = vpop.eup %3774 }
 0x75c   : > { %v2456_v33 = vmul.f32 %v3775_v63, %v3773_v41  ;;  %v3849_v41 = vld [vmem:[#allocation8 + $0xc0] ss:$16 sps:$4 sm:$0xff]   ;;  %v3850_v63 = vld [vmem:[#allocation8 + $0xc8] ss:$16 sps:$4 sm:$0xff]  }
 0x75e   : > { %v2461_v35 = vpack.c.bf16 %v2456_v33, %v2456_v33  ;;  %v3851_v33 = vld [vmem:[#allocation8 + $0xe4] ss:$16 sps:$4 sm:$0xff]  }
 0x760   : > { %2495 = vmatmul.mubr.bf16.vlgmr.msra.gmra.mrb[20].mxu0 %v2461_v35  ;;  %2536 = vmatmul.mubr.bf16.vlgmr.msra.gmra.mrb[20].mxu1 %v2461_v35  ;;  %v3852_v35 = vld [vmem:[#allocation8 + $0xec] ss:$16 sps:$4 sm:$0xff]  }
 0x761   : > { %2578 = vmatpush1.bf16.msra.mxu0 %v4639_v43  ;;  %2619 = vmatpush1.bf16.msra.mxu1 %v4654_v2  ;;  %v3824_v43 = vld [vmem:[#allocation8 + $0x4] ss:$16 sps:$4 sm:$0xff]  }
 0x762   : > { %2579 = vmatprep.subr.bf16.mxu0 %v4644_v45  ;;  %2620 = vmatprep.subr.bf16.mxu1 %v4664_v5  ;;  %v2457_v45 = vld [vmem:[#allocation2 + $0xa0] sm:$0xff] }
 0x763   : > { %2609 = vmatprep.mubr.bf16.mxu0 %v4085_v44  ;;  %2650 = vmatprep.mubr.bf16.mxu1 %v4085_v44 }
 0x765   : > { %2580 = vmatpush1.bf16.msra.mxu0 %v4647_v46  ;;  %2621 = vmatpush1.bf16.msra.mxu1 %v4666_v6  ;;  %v2458_v46 = vld [vmem:[#allocation2 + $0xa8] sm:$0xff] }
 0x766   : > { %2581 = vmatprep.subr.bf16.mxu0 %v4650_v47  ;;  %2622 = vmatprep.subr.bf16.mxu1 %v4674_v9 }
 0x769   : > { %2582 = vmatpush1.bf16.msra.mxu0 %v4657_v3  ;;  %2623 = vmatpush1.bf16.msra.mxu1 %v4678_v16 }
 0x76a   : > { %2583 = vmatprep.subr.bf16.mxu0 %v4661_v4  ;;  %2624 = vmatprep.subr.bf16.mxu1 %v4681_v18 }
 0x76d   : > { %2584 = vmatpush1.bf16.msra.mxu0 %v4670_v7  ;;  %2625 = vmatpush1.bf16.msra.mxu1 %v4690_v11 }
 0x76e   : > { %2585 = vmatprep.subr.bf16.mxu0 %v4672_v8  ;;  %2626 = vmatprep.subr.bf16.mxu1 %v4693_v12  ;;  %v2459_v12 = vld [vmem:[#allocation2 + $0xb0] sm:$0xff] }
 0x771   : > { %2586 = vmatpush1.bf16.msra.mxu0 %v4684_v17  ;;  %2627 = vmatpush1.bf16.msra.mxu1 %v4702_v22 }
 0x772   : > { %2587 = vmatprep.subr.bf16.mxu0 %v4687_v10  ;;  %2628 = vmatprep.subr.bf16.mxu1 %v4705_v13  ;;  %v2460_v10 = vld [vmem:[#allocation2 + $0xb8] sm:$0xff] }
 0x775   : > { %2588 = vmatpush1.bf16.msra.mxu0 %v4696_v19  ;;  %2629 = vmatpush1.bf16.msra.mxu1 %v4714_v21 }
 0x776   : > { %2589 = vmatprep.subr.bf16.mxu0 %v4698_v20  ;;  %2630 = vmatprep.subr.bf16.mxu1 %v4717_v23 }
 0x779   : > { %2590 = vmatpush1.bf16.msra.mxu0 %v4708_v14  ;;  %2631 = vmatpush1.bf16.msra.mxu1 %v4724_v48 }
 0x77a   : > { %2591 = vmatprep.subr.bf16.mxu0 %v4711_v15  ;;  %2632 = vmatprep.subr.bf16.mxu1 %v4727_v49 }
 0x77d   : > { %2592 = vmatpush1.bf16.msra.mxu0 %v4720_v24  ;;  %2633 = vmatpush1.bf16.msra.mxu1 %v4731_v50 }
 0x77e   : > { %2692 = vmatprep.subr.bf16.mxu0 %v3824_v43  ;;  %2733 = vmatprep.subr.bf16.mxu1 %v4652_v1  ;;  %v3853_v43 = vld [vmem:[#allocation8 + $0xe0] ss:$16 sps:$4 sm:$0xff]  }
 0x833   : > { %v2496_v47 = vpop.f32.mrb[20].mxu0  ;;  %v2537_v2 = vpop.f32.mrb[20].mxu1 }
 0x834   : > { %v2544_v3 = vadd.f32 %v2496_v47, %v2457_v45  ;;  %v2498_v4 = vpop.f32.mrb[21].mxu0  ;;  %v2539_v5 = vpop.f32.mrb[21].mxu1  ;;  %v2546_v19 = vadd.f32 %v2537_v2, %v2459_v12  ;;  %v3854_v45 = vld [vmem:[#allocation8 + $0xe8] ss:$16 sps:$4 sm:$0xff]  }
 0x835   : > { %v2545_v6 = vadd.f32 %v2498_v4, %v2458_v46  ;;  %v2500_v7 = vpop.f32.mrb[22].mxu0  ;;  %v2541_v8 = vpop.f32.mrb[22].mxu1  ;;  %v2547_v11 = vadd.f32 %v2539_v5, %v2460_v10  ;;  %v2572_v46 = vld [vmem:[#allocation2 + $0xc0] sm:$0xff]  ;;  %v2573_v47 = vld [vmem:[#allocation2 + $0xc8] sm:$0xff] }
 0x836   : > { %v3218_v9 = vmul.f32 -1.442695, %v2544_v3  ;;  %v2501_v16 = vpop.f32.mrb[23].mxu0  ;;  %v2542_v18 = vpop.f32.mrb[23].mxu1 }
 0x837   : > { %v3219_v17 = vmul.f32 -1.442695, %v2545_v6  ;;  %v3220_v1 = vmul.f32 -1.442695, %v2547_v11  ;;  %v2575_v11 = vld [vmem:[#allocation2 + $0xd8] sm:$0xff] }
 0x838   : > { %3776 = vpow2.f32 %v3218_v9 }
 0x839   : > { %3778 = vpow2.f32 %v3219_v17 }
 0x83a   : > { %3780 = vpow2.f32 %v3220_v1  ;;  %v2574_v1 = vld [vmem:[#allocation2 + $0xd0] sm:$0xff] }
 0x83b   : > { %3782 = vtanh.f32 %v2546_v19 }
 0x842   : > { %v3777_v20 = vpop.eup %3776 }
 0x843   : > { %v3779_v22 = vpop.eup %3778  ;;  %v2551_v13 = vadd.f32 1.0, %v3777_v20 }
 0x844   : > { %v2557_v14 = vadd.f32 1.0, %v3779_v22  ;;  %v3781_v15 = vpop.eup %3780 }
 0x845   : > { %3784 = vrcp.f32 %v2551_v13  ;;  %v3783_v21 = vpop.eup %3782  ;;  %v2564_v49 = vadd.f32 1.0, %v3781_v15 }
 0x846   : > { %3786 = vrcp.f32 %v2557_v14 }
 0x847   : > { %3788 = vrcp.f32 %v2564_v49 }
 0x84f   : > { %v3785_v23 = vpop.eup %3784 }
 0x850   : > { %v3787_v24 = vpop.eup %3786  ;;  %v2568_v48 = vmul.f32 %v3785_v23, %v3783_v21 }
 0x851   : > { %v2567_v50 = vmul.f32 %v3787_v24, %v4925_v62  ;;  %v3789_v36 = vpop.eup %3788  ;;  %v3848_v62 = vld [vmem:[#allocation8 + $0xcc] ss:$16 sps:$4 sm:$0xff]  }
 0x853   : > { %v4962_v52 = vadd.f32 %v2568_v48, %v2567_v50 }
 0x855   : > { %3790 = vtanh.f32 %v4962_v52 }
 0x85f   : > { %v3791_v55 = vpop.eup %3790 }
 0x860   : > { %v2571_v0 = vmul.f32 %v3791_v55, %v3789_v36 }
 0x862   : > { %v2576_v56 = vpack.c.bf16 %v2571_v0, %v2571_v0 }
 0x864   : > { %2610 = vmatmul.mubr.bf16.vlgmr.msra.gmra.mrb[24].mxu0 %v2576_v56  ;;  %2651 = vmatmul.mubr.bf16.vlgmr.msra.gmra.mrb[24].mxu1 %v2576_v56 }
 0x865   : > { %2693 = vmatpush1.bf16.msra.mxu0 %v3825_v37  ;;  %2734 = vmatpush1.bf16.msra.mxu1 %v3826_v38 }
 0x866   : > { %2694 = vmatprep.subr.bf16.mxu0 %v3827_v39  ;;  %2735 = vmatprep.subr.bf16.mxu1 %v3828_v57  ;;  %v2802_v39 = vld [vmem:[%s5060_s4] sm:$0xff]  ;;  %v2803_v57 = vld [vmem:[%s5060_s4 + $0x8] sm:$0xff] }
 0x867   : > { %2724 = vmatprep.mubr.bf16.mxu0 %v4085_v44  ;;  %2765 = vmatprep.mubr.bf16.mxu1 %v4085_v44  ;;  %v3839_v44 = vld [vmem:[#allocation8 + $0x84] ss:$16 sps:$4 sm:$0xff]  }
 0x869   : > { %2695 = vmatpush1.bf16.msra.mxu0 %v3829_v58  ;;  %2736 = vmatpush1.bf16.msra.mxu1 %v3830_v40  ;;  %v4086_v58 = vmov 0.0|0.0   ;;  %v2804_v40 = vld [vmem:[%s5060_s4 + $0x10] sm:$0xff] }
 0x86a   : > { %2696 = vmatprep.subr.bf16.mxu0 %v3831_v25  ;;  %2737 = vmatprep.subr.bf16.mxu1 %v3832_v42  ;;  %v2805_v25 = vld [vmem:[%s5060_s4 + $0x18] sm:$0xff] }
 0x86b   : > { %v3291_v42 = vpack.c.bf16 %v2805_v25, %v2804_v40 }
 0x86d   : > { %2697 = vmatpush1.bf16.msra.mxu0 %v3833_v26  ;;  %2738 = vmatpush1.bf16.msra.mxu1 %v3834_v27  ;;  %v2806_v26 = vld [vmem:[%s5060_s4 + $0x20] sm:$0xff]  ;;  %v2807_v27 = vld [vmem:[%s5060_s4 + $0x28] sm:$0xff] }
 0x86e   : > { %2698 = vmatprep.subr.bf16.mxu0 %v3835_v51  ;;  %2739 = vmatprep.subr.bf16.mxu1 %v3836_v53  ;;  %v3294_v51 = vpack.c.bf16 %v2807_v27, %v2806_v26  ;;  %v2808_v53 = vld [vmem:[%s5060_s4 + $0x30] sm:$0xff] }
 0x871   : > { %2699 = vmatpush1.bf16.msra.mxu0 %v3837_v28  ;;  %2740 = vmatpush1.bf16.msra.mxu1 %v3838_v29  ;;  %v2809_v28 = vld [vmem:[%s5060_s4 + $0x38] sm:$0xff] }
 0x872   : > { %2700 = vmatprep.subr.bf16.mxu0 %v3839_v44  ;;  %2741 = vmatprep.subr.bf16.mxu1 %v3840_v30  ;;  %v3297_v29 = vpack.c.bf16 %v2809_v28, %v2808_v53  ;;  %v2810_v44 = vld [vmem:[%s5060_s4 + $0x40] sm:$0xff]  ;;  %v2811_v30 = vld [vmem:[%s5060_s4 + $0x48] sm:$0xff] }
 0x875   : > { %2701 = vmatpush1.bf16.msra.mxu0 %v3841_v54  ;;  %2742 = vmatpush1.bf16.msra.mxu1 %v3842_v59  ;;  %v3300_v54 = vpack.c.bf16 %v2811_v30, %v2810_v44  ;;  %v2812_v59 = vld [vmem:[%s5060_s4 + $0x50] sm:$0xff] }
 0x876   : > { %2702 = vmatprep.subr.bf16.mxu0 %v3843_v60  ;;  %2743 = vmatprep.subr.bf16.mxu1 %v3844_v31  ;;  %v2813_v60 = vld [vmem:[%s5060_s4 + $0x58] sm:$0xff]  ;;  %v2814_v31 = vld [vmem:[%s5060_s4 + $0x60] sm:$0xff] }
 0x879   : > { %2703 = vmatpush1.bf16.msra.mxu0 %v3845_v32  ;;  %2744 = vmatpush1.bf16.msra.mxu1 %v3846_v34  ;;  %v3303_v32 = vpack.c.bf16 %v2813_v60, %v2812_v59  ;;  %v2815_v34 = vld [vmem:[%s5060_s4 + $0x68] sm:$0xff] }
 0x87a   : > { %2704 = vmatprep.subr.bf16.mxu0 %v3847_v61  ;;  %2745 = vmatprep.subr.bf16.mxu1 %v3848_v62  ;;  %v4088_v61 = vmov 0.0   ;;  %v3306_v62 = vpack.c.bf16 %v2815_v34, %v2814_v31 }
 0x87d   : > { %2705 = vmatpush1.bf16.msra.mxu0 %v3849_v41  ;;  %2746 = vmatpush1.bf16.msra.mxu1 %v3850_v63  ;;  %v2816_v41 = vld [vmem:[%s5060_s4 + $0x70] sm:$0xff]  ;;  %v2817_v63 = vld [vmem:[%s5060_s4 + $0x78] sm:$0xff] }
 0x87e   : > { %2706 = vmatprep.subr.bf16.mxu0 %v3851_v33  ;;  %2747 = vmatprep.subr.bf16.mxu1 %v3852_v35  ;;  %v3309_v33 = vpack.c.bf16 %v2817_v63, %v2816_v41  ;;  %v2687_v35 = vld [vmem:[#allocation2 + $0xe0] sm:$0xff] }
 0x881   : > { %2707 = vmatpush1.bf16.msra.mxu0 %v3853_v43  ;;  %2748 = vmatpush1.bf16.msra.mxu1 %v3854_v45  ;;  %v2688_v43 = vld [vmem:[#allocation2 + $0xe8] sm:$0xff] }
 0x882   : > { %3287 = vmatprep.subr.bf16.mxu0 %v4086_v58 }
 0x937   : > { %v2611_v2 = vpop.f32.mrb[24].mxu0  ;;  %v2652_v3 = vpop.f32.mrb[24].mxu1 }
 0x938   : > { %v2659_v4 = vadd.f32 %v2611_v2, %v2572_v46  ;;  %v2613_v5 = vpop.f32.mrb[25].mxu0  ;;  %v2654_v6 = vpop.f32.mrb[25].mxu1  ;;  %v2661_v20 = vadd.f32 %v2652_v3, %v2574_v1 }
 0x939   : > { %v2660_v7 = vadd.f32 %v2613_v5, %v2573_v47  ;;  %v2615_v8 = vpop.f32.mrb[26].mxu0  ;;  %v2656_v9 = vpop.f32.mrb[26].mxu1  ;;  %v2662_v12 = vadd.f32 %v2654_v6, %v2575_v11 }
 0x93a   : > { %v3221_v16 = vmul.f32 -1.442695, %v2659_v4  ;;  %v2616_v18 = vpop.f32.mrb[27].mxu0  ;;  %v2657_v17 = vpop.f32.mrb[27].mxu1 }
 0x93b   : > { %v3222_v10 = vmul.f32 -1.442695, %v2660_v7  ;;  %v3223_v19 = vmul.f32 -1.442695, %v2662_v12  ;;  %v2690_v18 = vld [vmem:[#allocation2 + $0xf8] sm:$0xff] }
 0x93c   : > { %3792 = vpow2.f32 %v3221_v16 }
 0x93d   : > { %3794 = vpow2.f32 %v3222_v10  ;;  %v2689_v10 = vld [vmem:[#allocation2 + $0xf0] sm:$0xff] }
 0x93e   : > { %3796 = vpow2.f32 %v3223_v19 }
 0x93f   : > { %3798 = vtanh.f32 %v2661_v20 }
 0x946   : > { %v3793_v22 = vpop.eup %3792 }
 0x947   : > { %v3795_v13 = vpop.eup %3794  ;;  %v2666_v14 = vadd.f32 1.0, %v3793_v22 }
 0x948   : > { %v2672_v15 = vadd.f32 1.0, %v3795_v13  ;;  %v3797_v21 = vpop.eup %3796 }
 0x949   : > { %3800 = vrcp.f32 %v2666_v14  ;;  %v3799_v23 = vpop.eup %3798  ;;  %v2679_v50 = vadd.f32 1.0, %v3797_v21 }
 0x94a   : > { %3802 = vrcp.f32 %v2672_v15 }
 0x94b   : > { %3804 = vrcp.f32 %v2679_v50 }
 0x953   : > { %v3801_v24 = vpop.eup %3800 }
 0x954   : > { %v3803_v48 = vpop.eup %3802  ;;  %v2683_v49 = vmul.f32 %v3801_v24, %v3799_v23 }
 0x955   : > { %v2682_v36 = vmul.f32 %v3803_v48, %v4962_v52  ;;  %v3805_v0 = vpop.eup %3804  ;;  %v3288_v52 = vpack.c.bf16 %v2803_v57, %v2802_v39 }
 0x957   : > { %v4968_v55 = vadd.f32 %v2683_v49, %v2682_v36 }
 0x959   : > { %3806 = vtanh.f32 %v4968_v55 }
 0x963   : > { %v3807_v56 = vpop.eup %3806 }
 0x964   : > { %v2686_v37 = vmul.f32 %v3807_v56, %v3805_v0  ;;  %v3227_v56 = vld [vmem:[#allocation11] ss:$0 sm:$0xff] }
 0x966   : > { %v2691_v38 = vpack.c.bf16 %v2686_v37, %v2686_v37 }
 0x968   : > { %2725 = vmatmul.mubr.bf16.vlgmr.msra.gmra.mrb[28].mxu0 %v2691_v38  ;;  %2766 = vmatmul.mubr.bf16.vlgmr.msra.gmra.mrb[28].mxu1 %v2691_v38 }
 0x969   : > { %3289 = vmatpush3.bf16.msra.mxu0 %v3288_v52  ;;  %3284 = vmatprep.mubr.msk.f32.mxu0 %vm4087_vm0, %v4088_v61 }
 0x96a   : > { %3290 = vmatprep.subr.bf16.mxu0 %v4086_v58 }
 0x96d   : > { %3292 = vmatpush3.bf16.msra.mxu0 %v3291_v42 }
 0x96e   : > { %3293 = vmatprep.subr.bf16.mxu0 %v4086_v58 }
 0x971   : > { %3295 = vmatpush3.bf16.msra.mxu0 %v3294_v51 }
 0x972   : > { %3296 = vmatprep.subr.bf16.mxu0 %v4086_v58 }
 0x975   : > { %3298 = vmatpush3.bf16.msra.mxu0 %v3297_v29 }
 0x976   : > { %3299 = vmatprep.subr.bf16.mxu0 %v4086_v58 }
 0x979   : > { %3301 = vmatpush3.bf16.msra.mxu0 %v3300_v54 }
 0x97a   : > { %3302 = vmatprep.subr.bf16.mxu0 %v4086_v58 }
 0x97d   : > { %3304 = vmatpush3.bf16.msra.mxu0 %v3303_v32 }
 0x97e   : > { %3305 = vmatprep.subr.bf16.mxu0 %v4086_v58 }
 0x981   : > { %3307 = vmatpush3.bf16.msra.mxu0 %v3306_v62 }
 0x982   : > { %3308 = vmatprep.subr.bf16.mxu0 %v4086_v58 }
 0x985   : > { %3310 = vmatpush3.bf16.msra.mxu0 %v3309_v33 }
 0xa3b   : > { %v2726_v45 = vpop.f32.mrb[28].mxu0  ;;  %v2767_v46 = vpop.f32.mrb[28].mxu1 }
 0xa3c   : > { %v2774_v47 = vadd.f32 %v2726_v45, %v2687_v35  ;;  %v2728_v2 = vpop.f32.mrb[29].mxu0  ;;  %v2769_v3 = vpop.f32.mrb[29].mxu1  ;;  %v2776_v12 = vadd.f32 %v2767_v46, %v2689_v10 }
 0xa3d   : > { %v2775_v4 = vadd.f32 %v2728_v2, %v2688_v43  ;;  %v2730_v5 = vpop.f32.mrb[30].mxu0  ;;  %v2771_v6 = vpop.f32.mrb[30].mxu1  ;;  %v2777_v17 = vadd.f32 %v2769_v3, %v2690_v18 }
 0xa3e   : > { %v3224_v7 = vmul.f32 -1.442695, %v2774_v47  ;;  %v2731_v8 = vpop.f32.mrb[31].mxu0  ;;  %v2772_v9 = vpop.f32.mrb[31].mxu1 }
 0xa3f   : > { %v3225_v16 = vmul.f32 -1.442695, %v2775_v4  ;;  %v3226_v11 = vmul.f32 -1.442695, %v2777_v17 }
 0xa40   : > { %3808 = vpow2.f32 %v3224_v7 }
 0xa41   : > { %3810 = vpow2.f32 %v3225_v16 }
 0xa42   : > { %3812 = vpow2.f32 %v3226_v11 }
 0xa43   : > { %3814 = vtanh.f32 %v2776_v12 }
 0xa4a   : > { %v3809_v1 = vpop.eup %3808 }
 0xa4b   : > { %v3811_v19 = vpop.eup %3810  ;;  %v2781_v20 = vadd.f32 1.0, %v3809_v1 }
 0xa4c   : > { %v2787_v22 = vadd.f32 1.0, %v3811_v19  ;;  %v3813_v13 = vpop.eup %3812 }
 0xa4d   : > { %3816 = vrcp.f32 %v2781_v20  ;;  %v3815_v14 = vpop.eup %3814  ;;  %v2794_v24 = vadd.f32 1.0, %v3813_v13 }
 0xa4e   : > { %3818 = vrcp.f32 %v2787_v22 }
 0xa4f   : > { %3820 = vrcp.f32 %v2794_v24 }
 0xa57   : > { %v3817_v15 = vpop.eup %3816 }
 0xa58   : > { %v3819_v21 = vpop.eup %3818  ;;  %v2798_v23 = vmul.f32 %v3817_v15, %v3815_v14 }
 0xa59   : > { %v2797_v48 = vmul.f32 %v3819_v21, %v4968_v55  ;;  %v3821_v50 = vpop.eup %3820 }
 0xa5b   : > { %v2799_v49 = vadd.f32 %v2798_v23, %v2797_v48 }
 0xa5d   : > { %3822 = vtanh.f32 %v2799_v49 }
 0xa67   : > { %v3823_v36 = vpop.eup %3822 }
 0xa68   : > { %v2801_v0 = vmul.f32 %v3823_v36, %v3821_v50 }
 0xa6a   : > { %3285 = vmatmul.mubr.f32.vlgmr.msra.gmra.mrb[32].mxu0 %v2801_v0 }
 0xb3d   : > { %v2891_v37 = vpop.f32.mrb[32].mxu0 }
 0xb3e   : > { %v2892_v38 = vadd.f32 %v3227_v56, %v2891_v37  ;;  %v3286_v39 = vpop.f32.mrb[33].mxu0 }
 0xb40   : > { %2896 = vst.msk [vmem:[#allocation12] sm:$0xff] %vm2895_vm1, %v2892_v38 }
 0xb41 PF: > { %p3387_p0 = scmp.eq.s32.totalorder %s4144_s25, 3  ;;  %s4089_s26 = smov [#allocation12]  }
 0xb42   : > { %s2904_s9 = sshll.u32 %s4089_s26, 4  ;;  %s2905_s9 = int_to_ptr.vmem [resolvable:$true] %s2904_s9 }
 0xb43   : > { %s3999_s11 = scalar_lea.vmem %s2905_s9, 128  ;;  %p4006_p6 = scmp.lt.s32.totalorder %s2905_s9, %s2905_s9 }
 0xb44   : > { %p4000_p9 = scmp.ne.s32.totalorder %s2905_s9, %s3999_s11  ;;  %p4007_p12 = scmp.lt.s32.totalorder %s3999_s11, %s3999_s11 }
 0xb46   : > { %p4001_p1 = pnand %p4000_p9, %p3387_p0  ;;  %p4008_p3 = por %p4007_p12, %p4006_p6 }
 0xb48   : > { %p4002_p4 = pneg %p4001_p1 }
 0xb4a   : > { %p4009_p5 = pnand %p4008_p3, %p4002_p4 }
 0xb4c   : > { %4012 = shalt.err (!%p4009_p5)
}
 0xb4d   : > { %s5088_s20 = sld [smem:[#allocation20_spill]] }
 0xb53   : > { %s4013_s21 = scalar_lea.hbm %s5088_s20, 128 }
 0xb54   : > { %p4014_p7 = scmp.ne.s32.totalorder %s5088_s20, %s4013_s21  ;;  %p4019_p2 = scmp.lt.u32.totalorder %s4013_s21, %s5088_s20 }
 0xb56   : > { %p4015_p11 = pnand %p4014_p7, %p3387_p0 }
 0xb58   : > { %p4016_p13 = pneg %p4015_p11 }
 0xb5a   : > { %p4021_p8 = pnand %p4019_p2, %p4016_p13 }
 0xb5c   : > { %4024 = shalt.err (!%p4021_p8)
}
 0xb5d   : > { %3360 = dma.vmem_to_hbm [thread:$0]  (%p3387_p0), %s2905_s9, 128, %s5088_s20, [#allocation5]  }
 0xb5e   : > { %4058 = dma.done.wait (%p3387_p0), [#allocation5], 128  }
 0xb5f   : > { %4060 = vsyncadd (%p3387_p0), [#allocation5], 4294967168 }
 0xb60 PF: > { %s5089_s24 = sld [smem:[#allocation18_spill]]  ;;  %s5090_s8 = sld [smem:[#allocation19_spill]] }
 0xb61   : > { %s5091_s21 = smov %s4067_s22  ;;  %s5092_s22 = smov %s4071_s23 }
 0xb66   : > { %p21_p10 = scmp.ge.s32.totalorder %s5089_s24, 6   ;;  %s5093_s23 = smov %s5090_s8 }
 0xb68   :  { %23 = sbr.rel (!%p21_p10) target bundleno = 9 (0x9), region = 118 }
 0xb6f   :  { %2917 = vsyncpa [#allocation4], 1 }
 0xb70   :  { %2919 = vsyncpa [#allocation4 + $0x1], 1 }
 0xb71   :  { %2920 = vsyncpa [#allocation7], 1 }
 0xb72   :  { %2922 = vsyncpa [#allocation7 + $0x1], 1 }
 0xb73   :  { %2923 = vsyncpa [#allocation10], 1 }
 0xb74   :  { %2924 = vsyncpa [#allocation5], 1 }
 0xb75   :  { %2926 = vsyncpa [#allocation5 + $0x1], 1 }

</bundles_post_ra>
